<compile_context>
chip_gen: v5e
topology: v5e:2x2
jax: 0.10.0
libtpu: 0.0.40
codegen_flags: <defaults>
</compile_context>

<pallas_src>
import functools

import jax
import jax.numpy as jnp
from jax import lax
from jax.experimental import pallas as pl
from jax.experimental.pallas import tpu as pltpu


# ----------------------------------------------------------------------------
# small helpers
# ----------------------------------------------------------------------------

def _round_up(x, m):
    return (x + m - 1) // m * m


def _pad_to(arr, axis, size):
    pad = size - arr.shape[axis]
    if pad == 0:
        return arr
    cfg = [(0, 0)] * arr.ndim
    cfg[axis] = (0, pad)
    return jnp.pad(arr, cfg)


def _pick_spatial_tile(hw, cap):
    """Largest tile dividing hw that is a multiple of 8 and <= cap."""
    if hw <= cap:
        return hw
    for t in range(cap, 7, -1):
        if hw % t == 0 and t % 8 == 0:
            return t
    return hw          # fallback: single tile


def _pick_lane_tile(d, cap=512):
    """(tile, padded_size) for a minor dim: full dim if small, else 512-tiles."""
    if d <= cap:
        return d, d
    return cap, _round_up(d, cap)


# ----------------------------------------------------------------------------
# Matmul kernel: bf16 MXU inputs, f32 accumulation, K-tiled, lane-dense output
# ----------------------------------------------------------------------------

def _matmul_kernel(a_ref, b_ref, bias_ref, o_ref, acc_ref, *, relu):
    k = pl.program_id(2)

    @pl.when(k == 0)
    def _():
        acc_ref[...] = jnp.zeros_like(acc_ref)

    acc_ref[...] += jnp.dot(a_ref[...], b_ref[...],
                            preferred_element_type=jnp.float32)

    @pl.when(k == pl.num_programs(2) - 1)
    def _():
        y = acc_ref[...] + bias_ref[...]          # (1, tn) broadcast, f32
        if relu:
            y = jnp.maximum(y, 0.0)
        o_ref[...] = y.astype(o_ref.dtype)


def pallas_matmul(a, b, bias=None, relu=False, out_dtype=jnp.bfloat16,
                  tile_m=512, tile_n=512, tile_k=512):
    """out = a @ b + bias (optional ReLU).  a:(M,K), b:(K,N), bias:(N,)."""
    M, K = a.shape
    K2, N = b.shape
    assert K == K2
    if bias is None:
        bias = jnp.zeros((N,), jnp.float32)

    a = a.astype(jnp.bfloat16)
    b = b.astype(jnp.bfloat16)
    bias = bias.astype(jnp.float32)

    tm = _round_up(M, 8) if M <= tile_m else tile_m
    tn = _round_up(N, 128) if N <= tile_n else tile_n     # lane-dense stores
    tk = K if K <= tile_k else tile_k                     # K-tiling only if large

    Mp, Np, Kp = _round_up(M, tm), _round_up(N, tn), _round_up(K, tk)
    a = _pad_to(_pad_to(a, 0, Mp), 1, Kp)
    b = _pad_to(_pad_to(b, 0, Kp), 1, Np)
    bias2 = _pad_to(bias.reshape(1, N), 1, Np)

    out = pl.pallas_call(
        functools.partial(_matmul_kernel, relu=relu),
        out_shape=jax.ShapeDtypeStruct((Mp, Np), out_dtype),
        grid=(Mp // tm, Np // tn, Kp // tk),
        in_specs=[
            pl.BlockSpec((tm, tk), lambda i, j, k: (i, k)),
            pl.BlockSpec((tk, tn), lambda i, j, k: (k, j)),
            pl.BlockSpec((1, tn), lambda i, j, k: (0, j)),
        ],
        out_specs=pl.BlockSpec((tm, tn), lambda i, j, k: (i, j)),
        scratch_shapes=[pltpu.VMEM((tm, tn), jnp.float32)],
        compiler_params=pltpu.CompilerParams(
            dimension_semantics=("parallel", "parallel", "arbitrary")),
    )(a, b, bias2)
    if Mp != M or Np != N:
        out = out[:M, :N]
    return out


# ----------------------------------------------------------------------------
# BatchNorm (training-mode batch stats): tiled stats pass + tiled apply pass
# ----------------------------------------------------------------------------

def _bn_stats_kernel(x_ref, sum_ref, sq_ref):
    x = x_ref[...].astype(jnp.float32)
    sum_ref[...] = jnp.sum(x, axis=0, keepdims=True)
    sq_ref[...] = jnp.sum(x * x, axis=0, keepdims=True)


def _scale_shift_kernel(x_ref, scale_ref, shift_ref, o_ref, *, relu):
    y = x_ref[...].astype(jnp.float32) * scale_ref[...] + shift_ref[...]
    if relu:
        y = jnp.maximum(y, 0.0)
    o_ref[...] = y.astype(o_ref.dtype)


def pallas_batchnorm(x2d, gamma, beta, eps=1e-5, relu=False,
                     out_dtype=jnp.bfloat16, tile_m=512):
    """BatchNorm over rows of x2d:(M,C) with biased variance (PyTorch train)."""
    M, C = x2d.shape
    tm = _round_up(M, 8) if M <= tile_m else tile_m
    Mp = _round_up(M, tm)
    xp = _pad_to(x2d, 0, Mp)
    nm = Mp // tm

    sums, sqs = pl.pallas_call(
        _bn_stats_kernel,
        out_shape=(jax.ShapeDtypeStruct((nm, C), jnp.float32),
                   jax.ShapeDtypeStruct((nm, C), jnp.float32)),
        grid=(nm,),
        in_specs=[pl.BlockSpec((tm, C), lambda i: (i, 0))],
        out_specs=(pl.BlockSpec((1, C), lambda i: (i, 0)),
                   pl.BlockSpec((1, C), lambda i: (i, 0))),
        compiler_params=pltpu.CompilerParams(
            dimension_semantics=("parallel",)),
    )(xp)

    # Tiny (C,) math — negligible vs. the tiled feature-map passes.
    s = jnp.sum(sums, axis=0)
    sq = jnp.sum(sqs, axis=0)
    mean = s / M                               # zero pad-rows contribute nothing
    var = jnp.maximum(sq / M - mean * mean, 0.0)
    scale = gamma.astype(jnp.float32) * lax.rsqrt(var + eps)
    shift = beta.astype(jnp.float32) - mean * scale

    y = pl.pallas_call(
        functools.partial(_scale_shift_kernel, relu=relu),
        out_shape=jax.ShapeDtypeStruct((Mp, C), out_dtype),
        grid=(nm,),
        in_specs=[pl.BlockSpec((tm, C), lambda i: (i, 0)),
                  pl.BlockSpec((1, C), lambda i: (0, 0)),
                  pl.BlockSpec((1, C), lambda i: (0, 0))],
        out_specs=pl.BlockSpec((tm, C), lambda i: (i, 0)),
        compiler_params=pltpu.CompilerParams(
            dimension_semantics=("parallel",)),
    )(xp, scale.reshape(1, C), shift.reshape(1, C))
    return y[:M] if Mp != M else y


def batchnorm2d(x, gamma, beta, relu=False, out_dtype=jnp.bfloat16):
    N, H, W, C = x.shape
    y = pallas_batchnorm(x.reshape(N * H * W, C), gamma, beta,
                         relu=relu, out_dtype=out_dtype)
    return y.reshape(N, H, W, C)


# ----------------------------------------------------------------------------
# OC self-attention: flash-style online softmax (no (HW,HW) materialization)
# ----------------------------------------------------------------------------

def _flash_attn_kernel(q_ref, k_ref, v_ref, o_ref, m_sc, l_sc, acc_sc, *, scale):
    kv = pl.program_id(2)

    @pl.when(kv == 0)
    def _():
        m_sc[...] = jnp.full_like(m_sc, -jnp.inf)
        l_sc[...] = jnp.zeros_like(l_sc)
        acc_sc[...] = jnp.zeros_like(acc_sc)

    q = q_ref[0]                                   # (tq, kc) bf16
    k = k_ref[0]                                   # (tk, kc) bf16
    v = v_ref[0]                                   # (tk, vc) bf16
    s = lax.dot_general(q, k, (((1,), (1,)), ((), ())),
                        preferred_element_type=jnp.float32) * scale   # (tq, tk) f32

    m_prev = m_sc[...]
    m_new = jnp.maximum(m_prev, jnp.max(s, axis=-1, keepdims=True))
    alpha = jnp.exp(m_prev - m_new)
    p = jnp.exp(s - m_new)
    l_sc[...] = alpha * l_sc[...] + jnp.sum(p, axis=-1, keepdims=True)
    acc_sc[...] = alpha * acc_sc[...] + jnp.dot(
        p.astype(v.dtype), v, preferred_element_type=jnp.float32)
    m_sc[...] = m_new

    @pl.when(kv == pl.num_programs(2) - 1)
    def _():
        o_ref[0] = (acc_sc[...] *
                    pl.reciprocal(l_sc[...], approx=True)).astype(o_ref.dtype)


def pallas_self_attention(qk, v, key_channels, tile_q=256, tile_kv=256):
    """OC self-attention with shared f_query/f_key.  qk:(N,H,W,kc), v:(N,H,W,vc)."""
    N, H, W, kc = qk.shape
    vc = v.shape[-1]
    HW = H * W
    q2 = qk.reshape(N, HW, kc).astype(jnp.bfloat16)
    v2 = v.reshape(N, HW, vc).astype(jnp.bfloat16)
    scale = float(key_channels) ** -0.5

    tq = _pick_spatial_tile(HW, tile_q)
    tk = _pick_spatial_tile(HW, tile_kv)

    out = pl.pallas_call(
        functools.partial(_flash_attn_kernel, scale=scale),
        out_shape=jax.ShapeDtypeStruct((N, HW, vc), jnp.bfloat16),
        grid=(N, HW // tq, HW // tk),
        in_specs=[
            pl.BlockSpec((1, tq, kc), lambda b, qi, ki: (b, qi, 0)),
            pl.BlockSpec((1, tk, kc), lambda b, qi, ki: (b, ki, 0)),
            pl.BlockSpec((1, tk, vc), lambda b, qi, ki: (b, ki, 0)),
        ],
        out_specs=pl.BlockSpec((1, tq, vc), lambda b, qi, ki: (b, qi, 0)),
        scratch_shapes=[pltpu.VMEM((tq, 1), jnp.float32),
                        pltpu.VMEM((tq, 1), jnp.float32),
                        pltpu.VMEM((tq, vc), jnp.float32)],
        compiler_params=pltpu.CompilerParams(
            dimension_semantics=("parallel", "parallel", "arbitrary")),
    )(q2, q2, v2)                                  # shared query/key tensor
    return out.reshape(N, H, W, vc)


# ----------------------------------------------------------------------------
# Conv-as-matmul
# ----------------------------------------------------------------------------

def _im2col(x, kh, kw, stride, pad):
    """x: NHWC -> patches:(N*Ho*Wo, kh*kw*C), row-major (kh,kw,C)."""
    N, H, W, C = x.shape
    xp = jnp.pad(x, ((0, 0), (pad, pad), (pad, pad), (0, 0)))
    Ho = (H + 2 * pad - kh) // stride + 1
    Wo = (W + 2 * pad - kw) // stride + 1
    cols = []
    for i in range(kh):
        for j in range(kw):
            cols.append(xp[:, i:i + stride * Ho:stride, j:j + stride * Wo:stride, :])
    patches = jnp.stack(cols, axis=3)
    return patches.reshape(N * Ho * Wo, kh * kw * C), Ho, Wo


def conv2d(x, w_pt, b, stride=1, pad=0, relu=False, out_dtype=jnp.bfloat16):
    """x: NHWC, w_pt: PyTorch layout (Cout, Cin, kh, kw), b: (Cout,)."""
    Cout, Cin, kh, kw = w_pt.shape
    N = x.shape[0]
    if kh == 1 and kw == 1 and stride == 1 and pad == 0:
        _, H, W, C = x.shape
        a = x.reshape(N * H * W, C)
        wmat = jnp.transpose(w_pt.reshape(Cout, Cin), (1, 0))
        y = pallas_matmul(a, wmat, b, relu=relu, out_dtype=out_dtype)
        return y.reshape(N, H, W, Cout)
    # 3x3 path: im2col in bf16 to halve the replicated-patch HBM traffic.
    # TODO(synk): tap-tiled K (shifted index_maps over kh*kw taps) would avoid
    # materializing patches entirely; not implemented here.
    patches, Ho, Wo = _im2col(x.astype(jnp.bfloat16), kh, kw, stride, pad)
    wmat = jnp.transpose(w_pt, (2, 3, 1, 0)).reshape(kh * kw * Cin, Cout)
    y = pallas_matmul(patches, wmat, b, relu=relu, out_dtype=out_dtype)
    return y.reshape(N, Ho, Wo, Cout)


# ----------------------------------------------------------------------------
# Bilinear resize (align_corners=True) as two Pallas batched matmuls, NHWC
# ----------------------------------------------------------------------------

def _interp_matrix(out_size, in_size):
    if out_size == 1:
        src = jnp.zeros((1,), jnp.float32)
    else:
        src = jnp.arange(out_size, dtype=jnp.float32) * (in_size - 1) / (out_size - 1)
    i0 = jnp.clip(jnp.floor(src).astype(jnp.int32), 0, in_size - 1)
    i1 = jnp.minimum(i0 + 1, in_size - 1)
    w1 = src - i0.astype(jnp.float32)
    w0 = 1.0 - w1
    rows = jnp.arange(out_size)
    A = jnp.zeros((out_size, in_size), jnp.float32)
    A = A.at[rows, i0].add(w0)
    A = A.at[rows, i1].add(w1)
    return A


def _resize_matmul_kernel(a_ref, x_ref, o_ref):
    o_ref[0] = jnp.dot(a_ref[...], x_ref[0].astype(jnp.float32),
                       preferred_element_type=jnp.float32).astype(o_ref.dtype)


def bilinear_resize_nhwc(x, out_h, out_w, out_dtype=None):
    """Separable align_corners=True resize; no wrapper-side transposes."""
    N, H, W, C = x.shape
    if out_dtype is None:
        out_dtype = x.dtype
    Ah = _interp_matrix(out_h, H)                       # (Ho, H)
    Aw = _interp_matrix(out_w, W)                       # (Wo, W)

    # height pass: y[n, i, w*c] = sum_h Ah[i, h] * x[n, h, w*c]
    D = W * C
    td, Dp = _pick_lane_tile(D)
    x2 = x.reshape(N, H, D)
    if Dp != D:
        x2 = _pad_to(x2, 2, Dp)
    y1 = pl.pallas_call(
        _resize_matmul_kernel,
        out_shape=jax.ShapeDtypeStruct((N, out_h, Dp), out_dtype),
        grid=(N, Dp // td),
        in_specs=[pl.BlockSpec((out_h, H), lambda b, d: (0, 0)),
                  pl.BlockSpec((1, H, td), lambda b, d: (b, 0, d))],
        out_specs=pl.BlockSpec((1, out_h, td), lambda b, d: (b, 0, d)),
        compiler_params=pltpu.CompilerParams(
            dimension_semantics=("parallel", "parallel")),
    )(Ah, x2)
    if Dp != D:
        y1 = y1[:, :, :D]
    y1 = y1.reshape(N * out_h, W, C)

    # width pass: z[r, j, c] = sum_w Aw[j, w] * y1[r, w, c]
    z = pl.pallas_call(
        _resize_matmul_kernel,
        out_shape=jax.ShapeDtypeStruct((N * out_h, out_w, C), out_dtype),
        grid=(N * out_h,),
        in_specs=[pl.BlockSpec((out_w, W), lambda r: (0, 0)),
                  pl.BlockSpec((1, W, C), lambda r: (r, 0, 0))],
        out_specs=pl.BlockSpec((1, out_w, C), lambda r: (r, 0, 0)),
        compiler_params=pltpu.CompilerParams(
            dimension_semantics=("parallel",)),
    )(Aw, y1)
    return z.reshape(N, out_h, out_w, C)


# ----------------------------------------------------------------------------
# ResNet_Base_OC forward
# ----------------------------------------------------------------------------

def init_params(key, cin, inplanes, outplanes, num_classes):
    kc = outplanes // 2
    vc = outplanes // 2
    ks = jax.random.split(key, 16)

    def w(k, shape, scale=0.1):
        return scale * jax.random.normal(k, shape, jnp.float32)

    p = {}
    # synthetic backbone: Conv3x3 s2 p1 -> BN -> ReLU
    p['bb_w'] = w(ks[0], (inplanes, cin, 3, 3)); p['bb_b'] = w(ks[1], (inplanes,))
    p['bb_gamma'] = jnp.ones((inplanes,), jnp.float32)
    p['bb_beta'] = jnp.zeros((inplanes,), jnp.float32)
    # context[0]: Conv3x3 p1 ; context[1]: BN
    p['ctx_w'] = w(ks[2], (outplanes, inplanes, 3, 3)); p['ctx_b'] = w(ks[3], (outplanes,))
    p['ctx_gamma'] = jnp.ones((outplanes,), jnp.float32)
    p['ctx_beta'] = jnp.zeros((outplanes,), jnp.float32)
    # BaseOC: f_key (=f_query, shared) 1x1 -> BN -> ReLU
    p['fkey_w'] = w(ks[4], (kc, outplanes, 1, 1)); p['fkey_b'] = w(ks[5], (kc,))
    p['fkey_gamma'] = jnp.ones((kc,), jnp.float32)
    p['fkey_beta'] = jnp.zeros((kc,), jnp.float32)
    # f_value 1x1
    p['fval_w'] = w(ks[6], (vc, outplanes, 1, 1)); p['fval_b'] = w(ks[7], (vc,))
    # W 1x1 (reference zero-inits; nonzero here so the path is exercised)
    p['W_w'] = w(ks[8], (outplanes, vc, 1, 1)); p['W_b'] = w(ks[9], (outplanes,))
    # conv_bn_dropout: Conv1x1(2*out -> out) -> BN -> ReLU -> Dropout(identity)
    p['fuse_w'] = w(ks[10], (outplanes, 2 * outplanes, 1, 1)); p['fuse_b'] = w(ks[11], (outplanes,))
    p['fuse_gamma'] = jnp.ones((outplanes,), jnp.float32)
    p['fuse_beta'] = jnp.zeros((outplanes,), jnp.float32)
    # cls head
    p['cls_w'] = w(ks[12], (num_classes, outplanes, 1, 1)); p['cls_b'] = w(ks[13], (num_classes,))
    return p


def resnet_base_oc_forward(params, x_nchw):
    N, Cin, H, W = x_nchw.shape
    x = jnp.transpose(x_nchw, (0, 2, 3, 1)).astype(jnp.float32)   # -> NHWC

    # backbone (synthetic stand-in)
    x = conv2d(x, params['bb_w'], params['bb_b'], stride=2, pad=1)
    x = batchnorm2d(x, params['bb_gamma'], params['bb_beta'], relu=True)

    # F.interpolate(..., size=(H//4, W//4), bilinear, align_corners=True)
    x = bilinear_resize_nhwc(x, H // 4, W // 4)

    # context: Conv3x3 -> BN -> BaseOC
    x = conv2d(x, params['ctx_w'], params['ctx_b'], stride=1, pad=1)
    feats = batchnorm2d(x, params['ctx_gamma'], params['ctx_beta'], relu=False)

    qk = conv2d(feats, params['fkey_w'], params['fkey_b'])
    qk = batchnorm2d(qk, params['fkey_gamma'], params['fkey_beta'], relu=True)
    val = conv2d(feats, params['fval_w'], params['fval_b'])
    ctx = pallas_self_attention(qk, val, key_channels=qk.shape[-1])
    ctx = conv2d(ctx, params['W_w'], params['W_b'])
    cat = jnp.concatenate([ctx, feats], axis=-1)       # torch.cat([context, feats], 1)
    out = conv2d(cat, params['fuse_w'], params['fuse_b'])
    out = batchnorm2d(out, params['fuse_gamma'], params['fuse_beta'], relu=True)
    # Dropout2d(0.05): identity (inference semantics)
    # TODO(synk): training-mode stochastic channel dropout not implemented.

    # cls + final upsample back to input resolution (f32 logits)
    out = conv2d(out, params['cls_w'], params['cls_b'], out_dtype=jnp.float32)
    out = bilinear_resize_nhwc(out, H, W, out_dtype=jnp.float32)

    return jnp.transpose(out, (0, 3, 1, 2))            # -> NCHW


# ----------------------------------------------------------------------------

if __name__ == "__main__":
    N, Cin, H, W = 2, 3, 16, 16
    inplanes, outplanes, num_classes = 8, 16, 5

    x = jax.random.normal(jax.random.PRNGKey(0), (N, Cin, H, W), jnp.float32)
    params = init_params(jax.random.PRNGKey(1), Cin, inplanes, outplanes, num_classes)

    fwd = jax.jit(resnet_base_oc_forward)
    y = fwd(params, x)
    y = jax.block_until_ready(y)

    assert y.shape == (N, num_classes, H, W), y.shape
    assert bool(jnp.all(jnp.isfinite(y)))
    print("KERNEL_OK")
</pallas_src>

<mosaic_0001>
module attributes {stable_mosaic.version = 11 : i64} {
  func.func @_bn_stats_kernel(%arg0: i32, %arg1: memref<128x8xbf16, #tpu.memory_space<vmem>>, %arg2: memref<1x8xf32, #tpu.memory_space<vmem>>, %arg3: memref<1x8xf32, #tpu.memory_space<vmem>>) attributes {dimension_semantics = [#tpu.dimension_semantics<parallel>], iteration_bounds = array<i64: 1>, scalar_prefetch = 0 : i64, scratch_operands = 0 : i64, tpu.core_type = #tpu.core_type<tc>, window_params = [{transform_indices = @transform_0, window_bounds = array<i64: 128, 8>}, {transform_indices = @transform_1, window_bounds = array<i64: 1, 8>}, {transform_indices = @transform_2, window_bounds = array<i64: 1, 8>}]} {
    %c0 = arith.constant 0 : index
    %c0_0 = arith.constant 0 : index
    %0 = vector.load %arg1[%c0, %c0_0] : memref<128x8xbf16, #tpu.memory_space<vmem>>, vector<128x8xbf16>
    %1 = arith.extf %0 : vector<128x8xbf16> to vector<128x8xf32>
    %cst = arith.constant dense<0.000000e+00> : vector<8xf32>
    %2 = vector.multi_reduction <add>, %1, %cst [0] : vector<128x8xf32> to vector<8xf32>
    %3 = vector.shape_cast %2 : vector<8xf32> to vector<1x8xf32>
    %c0_1 = arith.constant 0 : index
    %c0_2 = arith.constant 0 : index
    %4 = vector.load %arg2[%c0_1, %c0_2] : memref<1x8xf32, #tpu.memory_space<vmem>>, vector<1x8xf32>
    tpu.vector_store %arg2[%c0_1, %c0_2], %3 {strides = array<i32>} : memref<1x8xf32, #tpu.memory_space<vmem>>, vector<1x8xf32>,
    %5 = arith.mulf %1, %1 : vector<128x8xf32>
    %cst_3 = arith.constant dense<0.000000e+00> : vector<8xf32>
    %6 = vector.multi_reduction <add>, %5, %cst_3 [0] : vector<128x8xf32> to vector<8xf32>
    %7 = vector.shape_cast %6 : vector<8xf32> to vector<1x8xf32>
    %c0_4 = arith.constant 0 : index
    %c0_5 = arith.constant 0 : index
    %8 = vector.load %arg3[%c0_4, %c0_5] : memref<1x8xf32, #tpu.memory_space<vmem>>, vector<1x8xf32>
    tpu.vector_store %arg3[%c0_4, %c0_5], %7 {strides = array<i32>} : memref<1x8xf32, #tpu.memory_space<vmem>>, vector<1x8xf32>,
    return
  }
  func.func @transform_0(%arg0: i32) -> (i32, i32) {
    %c0_i32 = arith.constant 0 : i32
    %c0_i32_0 = arith.constant 0 : i32
    return %arg0, %c0_i32 : i32, i32
  }
  func.func @transform_1(%arg0: i32) -> (i32, i32) {
    %c0_i32 = arith.constant 0 : i32
    %c0_i32_0 = arith.constant 0 : i32
    return %arg0, %c0_i32 : i32, i32
  }
  func.func @transform_2(%arg0: i32) -> (i32, i32) {
    %c0_i32 = arith.constant 0 : i32
    %c0_i32_0 = arith.constant 0 : i32
    return %arg0, %c0_i32 : i32, i32
  }
}

module attributes {stable_mosaic.version = 11 : i64} {
  func.func @_matmul_kernel(%arg0: i32, %arg1: i32, %arg2: i32, %arg3: memref<128x27xbf16, #tpu.memory_space<vmem>>, %arg4: memref<27x128xbf16, #tpu.memory_space<vmem>>, %arg5: memref<1x128xf32, #tpu.memory_space<vmem>>, %arg6: memref<128x128xbf16, #tpu.memory_space<vmem>>, %arg7: memref<128x128xf32, #tpu.memory_space<vmem>>) attributes {dimension_semantics = [#tpu.dimension_semantics<parallel>, #tpu.dimension_semantics<parallel>, #tpu.dimension_semantics<arbitrary>], iteration_bounds = array<i64: 1, 1, 1>, scalar_prefetch = 0 : i64, scratch_operands = 1 : i64, tpu.core_type = #tpu.core_type<tc>, window_params = [{transform_indices = @transform_0, window_bounds = array<i64: 128, 27>}, {transform_indices = @transform_1, window_bounds = array<i64: 27, 128>}, {transform_indices = @transform_2, window_bounds = array<i64: 1, 128>}, {transform_indices = @transform_3, window_bounds = array<i64: 128, 128>}]} {
    %c0_i32 = arith.constant 0 : i32
    %0 = arith.cmpi eq, %arg2, %c0_i32 : i32
    %1 = arith.extui %0 : i1 to i32
    %c0_i32_0 = arith.constant 0 : i32
    %2 = arith.cmpi ne, %1, %c0_i32_0 : i32
    scf.if %2 {
      %cst_10 = arith.constant 0.000000e+00 : f32
      %12 = vector.broadcast %cst_10 : f32 to vector<128x128xf32>
      %c0_11 = arith.constant 0 : index
      %c0_12 = arith.constant 0 : index
      %13 = vector.load %arg7[%c0_11, %c0_12] : memref<128x128xf32, #tpu.memory_space<vmem>>, vector<128x128xf32>
      tpu.vector_store %arg7[%c0_11, %c0_12], %12 {strides = array<i32>} : memref<128x128xf32, #tpu.memory_space<vmem>>, vector<128x128xf32>,
    } else {
    }
    %c0 = arith.constant 0 : index
    %c0_1 = arith.constant 0 : index
    %3 = vector.load %arg7[%c0, %c0_1] : memref<128x128xf32, #tpu.memory_space<vmem>>, vector<128x128xf32>
    %c0_2 = arith.constant 0 : index
    %c0_3 = arith.constant 0 : index
    %4 = vector.load %arg3[%c0_2, %c0_3] : memref<128x27xbf16, #tpu.memory_space<vmem>>, vector<128x27xbf16>
    %c0_4 = arith.constant 0 : index
    %c0_5 = arith.constant 0 : index
    %5 = vector.load %arg4[%c0_4, %c0_5] : memref<27x128xbf16, #tpu.memory_space<vmem>>, vector<27x128xbf16>
    %cst = arith.constant dense<0.000000e+00> : vector<128x128xf32>
    %6 = tpu.matmul %4, %5, %cst {dimension_numbers = #tpu.dot_dimension_numbers<[1], [0], [0], [1], [0, 0, 1, 1], [], []>} : vector<128x27xbf16>, vector<27x128xbf16>, vector<128x128xf32> -> vector<128x128xf32>
    %7 = arith.addf %3, %6 : vector<128x128xf32>
    %c0_6 = arith.constant 0 : index
    %c0_7 = arith.constant 0 : index
    %8 = vector.load %arg7[%c0_6, %c0_7] : memref<128x128xf32, #tpu.memory_space<vmem>>, vector<128x128xf32>
    tpu.vector_store %arg7[%c0_6, %c0_7], %7 {strides = array<i32>} : memref<128x128xf32, #tpu.memory_space<vmem>>, vector<128x128xf32>,
    %c0_i32_8 = arith.constant 0 : i32
    %9 = arith.cmpi eq, %arg2, %c0_i32_8 : i32
    %10 = arith.extui %9 : i1 to i32
    %c0_i32_9 = arith.constant 0 : i32
    %11 = arith.cmpi ne, %10, %c0_i32_9 : i32
    scf.if %11 {
      %c0_10 = arith.constant 0 : index
      %c0_11 = arith.constant 0 : index
      %12 = vector.load %arg7[%c0_10, %c0_11] : memref<128x128xf32, #tpu.memory_space<vmem>>, vector<128x128xf32>
      %c0_12 = arith.constant 0 : index
      %c0_13 = arith.constant 0 : index
      %13 = vector.load %arg5[%c0_12, %c0_13] : memref<1x128xf32, #tpu.memory_space<vmem>>, vector<1x128xf32>
      %14 = vector.broadcast %13 : vector<1x128xf32> to vector<128x128xf32>
      %15 = arith.addf %12, %14 : vector<128x128xf32>
      %16 = arith.truncf %15 : vector<128x128xf32> to vector<128x128xbf16>
      %c0_14 = arith.constant 0 : index
      %c0_15 = arith.constant 0 : index
      %17 = vector.load %arg6[%c0_14, %c0_15] : memref<128x128xbf16, #tpu.memory_space<vmem>>, vector<128x128xbf16>
      tpu.vector_store %arg6[%c0_14, %c0_15], %16 {strides = array<i32>} : memref<128x128xbf16, #tpu.memory_space<vmem>>, vector<128x128xbf16>,
    } else {
    }
    return
  }
  func.func @transform_0(%arg0: i32, %arg1: i32, %arg2: i32) -> (i32, i32) {
    %c0_i32 = arith.constant 0 : i32
    return %arg0, %arg2 : i32, i32
  }
  func.func @transform_1(%arg0: i32, %arg1: i32, %arg2: i32) -> (i32, i32) {
    %c0_i32 = arith.constant 0 : i32
    return %arg2, %arg1 : i32, i32
  }
  func.func @transform_2(%arg0: i32, %arg1: i32, %arg2: i32) -> (i32, i32) {
    %c0_i32 = arith.constant 0 : i32
    %c0_i32_0 = arith.constant 0 : i32
    return %c0_i32, %arg1 : i32, i32
  }
  func.func @transform_3(%arg0: i32, %arg1: i32, %arg2: i32) -> (i32, i32) {
    %c0_i32 = arith.constant 0 : i32
    return %arg0, %arg1 : i32, i32
  }
}

module attributes {stable_mosaic.version = 11 : i64} {
  func.func @_scale_shift_kernel(%arg0: i32, %arg1: memref<128x8xbf16, #tpu.memory_space<vmem>>, %arg2: memref<1x8xf32, #tpu.memory_space<vmem>>, %arg3: memref<1x8xf32, #tpu.memory_space<vmem>>, %arg4: memref<128x8xbf16, #tpu.memory_space<vmem>>) attributes {dimension_semantics = [#tpu.dimension_semantics<parallel>], iteration_bounds = array<i64: 1>, scalar_prefetch = 0 : i64, scratch_operands = 0 : i64, tpu.core_type = #tpu.core_type<tc>, window_params = [{transform_indices = @transform_0, window_bounds = array<i64: 128, 8>}, {pipeline_mode = #tpu.pipeline_mode<synchronous>, transform_indices = @transform_1, window_bounds = array<i64: 1, 8>}, {pipeline_mode = #tpu.pipeline_mode<synchronous>, transform_indices = @transform_2, window_bounds = array<i64: 1, 8>}, {transform_indices = @transform_3, window_bounds = array<i64: 128, 8>}]} {
    %c0 = arith.constant 0 : index
    %c0_0 = arith.constant 0 : index
    %0 = vector.load %arg1[%c0, %c0_0] : memref<128x8xbf16, #tpu.memory_space<vmem>>, vector<128x8xbf16>
    %1 = arith.extf %0 : vector<128x8xbf16> to vector<128x8xf32>
    %c0_1 = arith.constant 0 : index
    %c0_2 = arith.constant 0 : index
    %2 = vector.load %arg2[%c0_1, %c0_2] : memref<1x8xf32, #tpu.memory_space<vmem>>, vector<1x8xf32>
    %3 = vector.broadcast %2 : vector<1x8xf32> to vector<128x8xf32>
    %4 = arith.mulf %1, %3 : vector<128x8xf32>
    %c0_3 = arith.constant 0 : index
    %c0_4 = arith.constant 0 : index
    %5 = vector.load %arg3[%c0_3, %c0_4] : memref<1x8xf32, #tpu.memory_space<vmem>>, vector<1x8xf32>
    %6 = vector.broadcast %5 : vector<1x8xf32> to vector<128x8xf32>
    %7 = arith.addf %4, %6 : vector<128x8xf32>
    %cst = arith.constant 0.000000e+00 : f32
    %8 = vector.broadcast %cst : f32 to vector<128x8xf32>
    %9 = arith.maximumf %7, %8 : vector<128x8xf32>
    %10 = arith.truncf %9 : vector<128x8xf32> to vector<128x8xbf16>
    %c0_5 = arith.constant 0 : index
    %c0_6 = arith.constant 0 : index
    %11 = vector.load %arg4[%c0_5, %c0_6] : memref<128x8xbf16, #tpu.memory_space<vmem>>, vector<128x8xbf16>
    tpu.vector_store %arg4[%c0_5, %c0_6], %10 {strides = array<i32>} : memref<128x8xbf16, #tpu.memory_space<vmem>>, vector<128x8xbf16>,
    return
  }
  func.func @transform_0(%arg0: i32) -> (i32, i32) {
    %c0_i32 = arith.constant 0 : i32
    %c0_i32_0 = arith.constant 0 : i32
    return %arg0, %c0_i32 : i32, i32
  }
  func.func @transform_1(%arg0: i32) -> (i32, i32) {
    %c0_i32 = arith.constant 0 : i32
    %c0_i32_0 = arith.constant 0 : i32
    %c0_i32_1 = arith.constant 0 : i32
    return %c0_i32, %c0_i32_0 : i32, i32
  }
  func.func @transform_2(%arg0: i32) -> (i32, i32) {
    %c0_i32 = arith.constant 0 : i32
    %c0_i32_0 = arith.constant 0 : i32
    %c0_i32_1 = arith.constant 0 : i32
    return %c0_i32, %c0_i32_0 : i32, i32
  }
  func.func @transform_3(%arg0: i32) -> (i32, i32) {
    %c0_i32 = arith.constant 0 : i32
    %c0_i32_0 = arith.constant 0 : i32
    return %arg0, %c0_i32 : i32, i32
  }
}

module attributes {stable_mosaic.version = 11 : i64} {
  func.func @_resize_matmul_kernel(%arg0: i32, %arg1: i32, %arg2: memref<4x8xf32, #tpu.memory_space<vmem>>, %arg3: memref<1x8x64xbf16, #tpu.memory_space<vmem>>, %arg4: memref<1x4x64xbf16, #tpu.memory_space<vmem>>) attributes {dimension_semantics = [#tpu.dimension_semantics<parallel>, #tpu.dimension_semantics<parallel>], iteration_bounds = array<i64: 2, 1>, scalar_prefetch = 0 : i64, scratch_operands = 0 : i64, tpu.core_type = #tpu.core_type<tc>, window_params = [{pipeline_mode = #tpu.pipeline_mode<synchronous>, transform_indices = @transform_0, window_bounds = array<i64: 4, 8>}, {transform_indices = @transform_1, window_bounds = array<i64: 1, 8, 64>}, {transform_indices = @transform_2, window_bounds = array<i64: 1, 4, 64>}]} {
    %c0 = arith.constant 0 : index
    %c0_0 = arith.constant 0 : index
    %0 = vector.load %arg2[%c0, %c0_0] : memref<4x8xf32, #tpu.memory_space<vmem>>, vector<4x8xf32>
    %c0_1 = arith.constant 0 : index
    %c0_2 = arith.constant 0 : index
    %c0_3 = arith.constant 0 : index
    %1 = vector.load %arg3[%c0_1, %c0_2, %c0_3] : memref<1x8x64xbf16, #tpu.memory_space<vmem>>, vector<1x8x64xbf16>
    %2 = vector.shape_cast %1 : vector<1x8x64xbf16> to vector<8x64xbf16>
    %3 = arith.extf %2 : vector<8x64xbf16> to vector<8x64xf32>
    %cst = arith.constant dense<0.000000e+00> : vector<4x64xf32>
    %4 = tpu.matmul %0, %3, %cst {dimension_numbers = #tpu.dot_dimension_numbers<[1], [0], [0], [1], [0, 0, 1, 1], [], []>} : vector<4x8xf32>, vector<8x64xf32>, vector<4x64xf32> -> vector<4x64xf32>
    %5 = arith.truncf %4 : vector<4x64xf32> to vector<4x64xbf16>
    %c0_4 = arith.constant 0 : index
    %c0_5 = arith.constant 0 : index
    %c0_6 = arith.constant 0 : index
    %6 = vector.load %arg4[%c0_4, %c0_5, %c0_6] : memref<1x4x64xbf16, #tpu.memory_space<vmem>>, vector<1x4x64xbf16>
    %7 = vector.shape_cast %6 : vector<1x4x64xbf16> to vector<4x64xbf16>
    %8 = vector.shape_cast %5 : vector<4x64xbf16> to vector<1x4x64xbf16>
    tpu.vector_store %arg4[%c0_4, %c0_5, %c0_6], %8 {strides = array<i32>} : memref<1x4x64xbf16, #tpu.memory_space<vmem>>, vector<1x4x64xbf16>,
    return
  }
  func.func @transform_0(%arg0: i32, %arg1: i32) -> (i32, i32) {
    %c0_i32 = arith.constant 0 : i32
    %c0_i32_0 = arith.constant 0 : i32
    %c0_i32_1 = arith.constant 0 : i32
    return %c0_i32, %c0_i32_0 : i32, i32
  }
  func.func @transform_1(%arg0: i32, %arg1: i32) -> (i32, i32, i32) {
    %c0_i32 = arith.constant 0 : i32
    %c0_i32_0 = arith.constant 0 : i32
    return %arg0, %c0_i32, %arg1 : i32, i32, i32
  }
  func.func @transform_2(%arg0: i32, %arg1: i32) -> (i32, i32, i32) {
    %c0_i32 = arith.constant 0 : i32
    %c0_i32_0 = arith.constant 0 : i32
    return %arg0, %c0_i32, %arg1 : i32, i32, i32
  }
}

module attributes {stable_mosaic.version = 11 : i64} {
  func.func @_resize_matmul_kernel(%arg0: i32, %arg1: memref<4x8xf32, #tpu.memory_space<vmem>>, %arg2: memref<1x8x8xbf16, #tpu.memory_space<vmem>>, %arg3: memref<1x4x8xbf16, #tpu.memory_space<vmem>>) attributes {dimension_semantics = [#tpu.dimension_semantics<parallel>], iteration_bounds = array<i64: 8>, scalar_prefetch = 0 : i64, scratch_operands = 0 : i64, tpu.core_type = #tpu.core_type<tc>, window_params = [{pipeline_mode = #tpu.pipeline_mode<synchronous>, transform_indices = @transform_0, window_bounds = array<i64: 4, 8>}, {transform_indices = @transform_1, window_bounds = array<i64: 1, 8, 8>}, {transform_indices = @transform_2, window_bounds = array<i64: 1, 4, 8>}]} {
    %c0 = arith.constant 0 : index
    %c0_0 = arith.constant 0 : index
    %0 = vector.load %arg1[%c0, %c0_0] : memref<4x8xf32, #tpu.memory_space<vmem>>, vector<4x8xf32>
    %c0_1 = arith.constant 0 : index
    %c0_2 = arith.constant 0 : index
    %c0_3 = arith.constant 0 : index
    %1 = vector.load %arg2[%c0_1, %c0_2, %c0_3] : memref<1x8x8xbf16, #tpu.memory_space<vmem>>, vector<1x8x8xbf16>
    %2 = vector.shape_cast %1 : vector<1x8x8xbf16> to vector<8x8xbf16>
    %3 = arith.extf %2 : vector<8x8xbf16> to vector<8x8xf32>
    %cst = arith.constant dense<0.000000e+00> : vector<4x8xf32>
    %4 = tpu.matmul %0, %3, %cst {dimension_numbers = #tpu.dot_dimension_numbers<[1], [0], [0], [1], [0, 0, 1, 1], [], []>} : vector<4x8xf32>, vector<8x8xf32>, vector<4x8xf32> -> vector<4x8xf32>
    %5 = arith.truncf %4 : vector<4x8xf32> to vector<4x8xbf16>
    %c0_4 = arith.constant 0 : index
    %c0_5 = arith.constant 0 : index
    %c0_6 = arith.constant 0 : index
    %6 = vector.load %arg3[%c0_4, %c0_5, %c0_6] : memref<1x4x8xbf16, #tpu.memory_space<vmem>>, vector<1x4x8xbf16>
    %7 = vector.shape_cast %6 : vector<1x4x8xbf16> to vector<4x8xbf16>
    %8 = vector.shape_cast %5 : vector<4x8xbf16> to vector<1x4x8xbf16>
    tpu.vector_store %arg3[%c0_4, %c0_5, %c0_6], %8 {strides = array<i32>} : memref<1x4x8xbf16, #tpu.memory_space<vmem>>, vector<1x4x8xbf16>,
    return
  }
  func.func @transform_0(%arg0: i32) -> (i32, i32) {
    %c0_i32 = arith.constant 0 : i32
    %c0_i32_0 = arith.constant 0 : i32
    %c0_i32_1 = arith.constant 0 : i32
    return %c0_i32, %c0_i32_0 : i32, i32
  }
  func.func @transform_1(%arg0: i32) -> (i32, i32, i32) {
    %c0_i32 = arith.constant 0 : i32
    %c0_i32_0 = arith.constant 0 : i32
    %c0_i32_1 = arith.constant 0 : i32
    return %arg0, %c0_i32, %c0_i32_0 : i32, i32, i32
  }
  func.func @transform_2(%arg0: i32) -> (i32, i32, i32) {
    %c0_i32 = arith.constant 0 : i32
    %c0_i32_0 = arith.constant 0 : i32
    %c0_i32_1 = arith.constant 0 : i32
    return %arg0, %c0_i32, %c0_i32_0 : i32, i32, i32
  }
}

module attributes {stable_mosaic.version = 11 : i64} {
  func.func @_bn_stats_kernel(%arg0: i32, %arg1: memref<32x16xbf16, #tpu.memory_space<vmem>>, %arg2: memref<1x16xf32, #tpu.memory_space<vmem>>, %arg3: memref<1x16xf32, #tpu.memory_space<vmem>>) attributes {dimension_semantics = [#tpu.dimension_semantics<parallel>], iteration_bounds = array<i64: 1>, scalar_prefetch = 0 : i64, scratch_operands = 0 : i64, tpu.core_type = #tpu.core_type<tc>, window_params = [{transform_indices = @transform_0, window_bounds = array<i64: 32, 16>}, {transform_indices = @transform_1, window_bounds = array<i64: 1, 16>}, {transform_indices = @transform_2, window_bounds = array<i64: 1, 16>}]} {
    %c0 = arith.constant 0 : index
    %c0_0 = arith.constant 0 : index
    %0 = vector.load %arg1[%c0, %c0_0] : memref<32x16xbf16, #tpu.memory_space<vmem>>, vector<32x16xbf16>
    %1 = arith.extf %0 : vector<32x16xbf16> to vector<32x16xf32>
    %cst = arith.constant dense<0.000000e+00> : vector<16xf32>
    %2 = vector.multi_reduction <add>, %1, %cst [0] : vector<32x16xf32> to vector<16xf32>
    %3 = vector.shape_cast %2 : vector<16xf32> to vector<1x16xf32>
    %c0_1 = arith.constant 0 : index
    %c0_2 = arith.constant 0 : index
    %4 = vector.load %arg2[%c0_1, %c0_2] : memref<1x16xf32, #tpu.memory_space<vmem>>, vector<1x16xf32>
    tpu.vector_store %arg2[%c0_1, %c0_2], %3 {strides = array<i32>} : memref<1x16xf32, #tpu.memory_space<vmem>>, vector<1x16xf32>,
    %5 = arith.mulf %1, %1 : vector<32x16xf32>
    %cst_3 = arith.constant dense<0.000000e+00> : vector<16xf32>
    %6 = vector.multi_reduction <add>, %5, %cst_3 [0] : vector<32x16xf32> to vector<16xf32>
    %7 = vector.shape_cast %6 : vector<16xf32> to vector<1x16xf32>
    %c0_4 = arith.constant 0 : index
    %c0_5 = arith.constant 0 : index
    %8 = vector.load %arg3[%c0_4, %c0_5] : memref<1x16xf32, #tpu.memory_space<vmem>>, vector<1x16xf32>
    tpu.vector_store %arg3[%c0_4, %c0_5], %7 {strides = array<i32>} : memref<1x16xf32, #tpu.memory_space<vmem>>, vector<1x16xf32>,
    return
  }
  func.func @transform_0(%arg0: i32) -> (i32, i32) {
    %c0_i32 = arith.constant 0 : i32
    %c0_i32_0 = arith.constant 0 : i32
    return %arg0, %c0_i32 : i32, i32
  }
  func.func @transform_1(%arg0: i32) -> (i32, i32) {
    %c0_i32 = arith.constant 0 : i32
    %c0_i32_0 = arith.constant 0 : i32
    return %arg0, %c0_i32 : i32, i32
  }
  func.func @transform_2(%arg0: i32) -> (i32, i32) {
    %c0_i32 = arith.constant 0 : i32
    %c0_i32_0 = arith.constant 0 : i32
    return %arg0, %c0_i32 : i32, i32
  }
}

module attributes {stable_mosaic.version = 11 : i64} {
  func.func @_matmul_kernel(%arg0: i32, %arg1: i32, %arg2: i32, %arg3: memref<32x72xbf16, #tpu.memory_space<vmem>>, %arg4: memref<72x128xbf16, #tpu.memory_space<vmem>>, %arg5: memref<1x128xf32, #tpu.memory_space<vmem>>, %arg6: memref<32x128xbf16, #tpu.memory_space<vmem>>, %arg7: memref<32x128xf32, #tpu.memory_space<vmem>>) attributes {dimension_semantics = [#tpu.dimension_semantics<parallel>, #tpu.dimension_semantics<parallel>, #tpu.dimension_semantics<arbitrary>], iteration_bounds = array<i64: 1, 1, 1>, scalar_prefetch = 0 : i64, scratch_operands = 1 : i64, tpu.core_type = #tpu.core_type<tc>, window_params = [{transform_indices = @transform_0, window_bounds = array<i64: 32, 72>}, {transform_indices = @transform_1, window_bounds = array<i64: 72, 128>}, {transform_indices = @transform_2, window_bounds = array<i64: 1, 128>}, {transform_indices = @transform_3, window_bounds = array<i64: 32, 128>}]} {
    %c0_i32 = arith.constant 0 : i32
    %0 = arith.cmpi eq, %arg2, %c0_i32 : i32
    %1 = arith.extui %0 : i1 to i32
    %c0_i32_0 = arith.constant 0 : i32
    %2 = arith.cmpi ne, %1, %c0_i32_0 : i32
    scf.if %2 {
      %cst_10 = arith.constant 0.000000e+00 : f32
      %12 = vector.broadcast %cst_10 : f32 to vector<32x128xf32>
      %c0_11 = arith.constant 0 : index
      %c0_12 = arith.constant 0 : index
      %13 = vector.load %arg7[%c0_11, %c0_12] : memref<32x128xf32, #tpu.memory_space<vmem>>, vector<32x128xf32>
      tpu.vector_store %arg7[%c0_11, %c0_12], %12 {strides = array<i32>} : memref<32x128xf32, #tpu.memory_space<vmem>>, vector<32x128xf32>,
    } else {
    }
    %c0 = arith.constant 0 : index
    %c0_1 = arith.constant 0 : index
    %3 = vector.load %arg7[%c0, %c0_1] : memref<32x128xf32, #tpu.memory_space<vmem>>, vector<32x128xf32>
    %c0_2 = arith.constant 0 : index
    %c0_3 = arith.constant 0 : index
    %4 = vector.load %arg3[%c0_2, %c0_3] : memref<32x72xbf16, #tpu.memory_space<vmem>>, vector<32x72xbf16>
    %c0_4 = arith.constant 0 : index
    %c0_5 = arith.constant 0 : index
    %5 = vector.load %arg4[%c0_4, %c0_5] : memref<72x128xbf16, #tpu.memory_space<vmem>>, vector<72x128xbf16>
    %cst = arith.constant dense<0.000000e+00> : vector<32x128xf32>
    %6 = tpu.matmul %4, %5, %cst {dimension_numbers = #tpu.dot_dimension_numbers<[1], [0], [0], [1], [0, 0, 1, 1], [], []>} : vector<32x72xbf16>, vector<72x128xbf16>, vector<32x128xf32> -> vector<32x128xf32>
    %7 = arith.addf %3, %6 : vector<32x128xf32>
    %c0_6 = arith.constant 0 : index
    %c0_7 = arith.constant 0 : index
    %8 = vector.load %arg7[%c0_6, %c0_7] : memref<32x128xf32, #tpu.memory_space<vmem>>, vector<32x128xf32>
    tpu.vector_store %arg7[%c0_6, %c0_7], %7 {strides = array<i32>} : memref<32x128xf32, #tpu.memory_space<vmem>>, vector<32x128xf32>,
    %c0_i32_8 = arith.constant 0 : i32
    %9 = arith.cmpi eq, %arg2, %c0_i32_8 : i32
    %10 = arith.extui %9 : i1 to i32
    %c0_i32_9 = arith.constant 0 : i32
    %11 = arith.cmpi ne, %10, %c0_i32_9 : i32
    scf.if %11 {
      %c0_10 = arith.constant 0 : index
      %c0_11 = arith.constant 0 : index
      %12 = vector.load %arg7[%c0_10, %c0_11] : memref<32x128xf32, #tpu.memory_space<vmem>>, vector<32x128xf32>
      %c0_12 = arith.constant 0 : index
      %c0_13 = arith.constant 0 : index
      %13 = vector.load %arg5[%c0_12, %c0_13] : memref<1x128xf32, #tpu.memory_space<vmem>>, vector<1x128xf32>
      %14 = vector.broadcast %13 : vector<1x128xf32> to vector<32x128xf32>
      %15 = arith.addf %12, %14 : vector<32x128xf32>
      %16 = arith.truncf %15 : vector<32x128xf32> to vector<32x128xbf16>
      %c0_14 = arith.constant 0 : index
      %c0_15 = arith.constant 0 : index
      %17 = vector.load %arg6[%c0_14, %c0_15] : memref<32x128xbf16, #tpu.memory_space<vmem>>, vector<32x128xbf16>
      tpu.vector_store %arg6[%c0_14, %c0_15], %16 {strides = array<i32>} : memref<32x128xbf16, #tpu.memory_space<vmem>>, vector<32x128xbf16>,
    } else {
    }
    return
  }
  func.func @transform_0(%arg0: i32, %arg1: i32, %arg2: i32) -> (i32, i32) {
    %c0_i32 = arith.constant 0 : i32
    return %arg0, %arg2 : i32, i32
  }
  func.func @transform_1(%arg0: i32, %arg1: i32, %arg2: i32) -> (i32, i32) {
    %c0_i32 = arith.constant 0 : i32
    return %arg2, %arg1 : i32, i32
  }
  func.func @transform_2(%arg0: i32, %arg1: i32, %arg2: i32) -> (i32, i32) {
    %c0_i32 = arith.constant 0 : i32
    %c0_i32_0 = arith.constant 0 : i32
    return %c0_i32, %arg1 : i32, i32
  }
  func.func @transform_3(%arg0: i32, %arg1: i32, %arg2: i32) -> (i32, i32) {
    %c0_i32 = arith.constant 0 : i32
    return %arg0, %arg1 : i32, i32
  }
}

module attributes {stable_mosaic.version = 11 : i64} {
  func.func @_scale_shift_kernel(%arg0: i32, %arg1: memref<32x16xbf16, #tpu.memory_space<vmem>>, %arg2: memref<1x16xf32, #tpu.memory_space<vmem>>, %arg3: memref<1x16xf32, #tpu.memory_space<vmem>>, %arg4: memref<32x16xbf16, #tpu.memory_space<vmem>>) attributes {dimension_semantics = [#tpu.dimension_semantics<parallel>], iteration_bounds = array<i64: 1>, scalar_prefetch = 0 : i64, scratch_operands = 0 : i64, tpu.core_type = #tpu.core_type<tc>, window_params = [{transform_indices = @transform_0, window_bounds = array<i64: 32, 16>}, {pipeline_mode = #tpu.pipeline_mode<synchronous>, transform_indices = @transform_1, window_bounds = array<i64: 1, 16>}, {pipeline_mode = #tpu.pipeline_mode<synchronous>, transform_indices = @transform_2, window_bounds = array<i64: 1, 16>}, {transform_indices = @transform_3, window_bounds = array<i64: 32, 16>}]} {
    %c0 = arith.constant 0 : index
    %c0_0 = arith.constant 0 : index
    %0 = vector.load %arg1[%c0, %c0_0] : memref<32x16xbf16, #tpu.memory_space<vmem>>, vector<32x16xbf16>
    %1 = arith.extf %0 : vector<32x16xbf16> to vector<32x16xf32>
    %c0_1 = arith.constant 0 : index
    %c0_2 = arith.constant 0 : index
    %2 = vector.load %arg2[%c0_1, %c0_2] : memref<1x16xf32, #tpu.memory_space<vmem>>, vector<1x16xf32>
    %3 = vector.broadcast %2 : vector<1x16xf32> to vector<32x16xf32>
    %4 = arith.mulf %1, %3 : vector<32x16xf32>
    %c0_3 = arith.constant 0 : index
    %c0_4 = arith.constant 0 : index
    %5 = vector.load %arg3[%c0_3, %c0_4] : memref<1x16xf32, #tpu.memory_space<vmem>>, vector<1x16xf32>
    %6 = vector.broadcast %5 : vector<1x16xf32> to vector<32x16xf32>
    %7 = arith.addf %4, %6 : vector<32x16xf32>
    %8 = arith.truncf %7 : vector<32x16xf32> to vector<32x16xbf16>
    %c0_5 = arith.constant 0 : index
    %c0_6 = arith.constant 0 : index
    %9 = vector.load %arg4[%c0_5, %c0_6] : memref<32x16xbf16, #tpu.memory_space<vmem>>, vector<32x16xbf16>
    tpu.vector_store %arg4[%c0_5, %c0_6], %8 {strides = array<i32>} : memref<32x16xbf16, #tpu.memory_space<vmem>>, vector<32x16xbf16>,
    return
  }
  func.func @transform_0(%arg0: i32) -> (i32, i32) {
    %c0_i32 = arith.constant 0 : i32
    %c0_i32_0 = arith.constant 0 : i32
    return %arg0, %c0_i32 : i32, i32
  }
  func.func @transform_1(%arg0: i32) -> (i32, i32) {
    %c0_i32 = arith.constant 0 : i32
    %c0_i32_0 = arith.constant 0 : i32
    %c0_i32_1 = arith.constant 0 : i32
    return %c0_i32, %c0_i32_0 : i32, i32
  }
  func.func @transform_2(%arg0: i32) -> (i32, i32) {
    %c0_i32 = arith.constant 0 : i32
    %c0_i32_0 = arith.constant 0 : i32
    %c0_i32_1 = arith.constant 0 : i32
    return %c0_i32, %c0_i32_0 : i32, i32
  }
  func.func @transform_3(%arg0: i32) -> (i32, i32) {
    %c0_i32 = arith.constant 0 : i32
    %c0_i32_0 = arith.constant 0 : i32
    return %arg0, %c0_i32 : i32, i32
  }
}

module attributes {stable_mosaic.version = 11 : i64} {
  func.func @_matmul_kernel(%arg0: i32, %arg1: i32, %arg2: i32, %arg3: memref<32x16xbf16, #tpu.memory_space<vmem>>, %arg4: memref<16x128xbf16, #tpu.memory_space<vmem>>, %arg5: memref<1x128xf32, #tpu.memory_space<vmem>>, %arg6: memref<32x128xbf16, #tpu.memory_space<vmem>>, %arg7: memref<32x128xf32, #tpu.memory_space<vmem>>) attributes {dimension_semantics = [#tpu.dimension_semantics<parallel>, #tpu.dimension_semantics<parallel>, #tpu.dimension_semantics<arbitrary>], iteration_bounds = array<i64: 1, 1, 1>, scalar_prefetch = 0 : i64, scratch_operands = 1 : i64, tpu.core_type = #tpu.core_type<tc>, window_params = [{transform_indices = @transform_0, window_bounds = array<i64: 32, 16>}, {transform_indices = @transform_1, window_bounds = array<i64: 16, 128>}, {transform_indices = @transform_2, window_bounds = array<i64: 1, 128>}, {transform_indices = @transform_3, window_bounds = array<i64: 32, 128>}]} {
    %c0_i32 = arith.constant 0 : i32
    %0 = arith.cmpi eq, %arg2, %c0_i32 : i32
    %1 = arith.extui %0 : i1 to i32
    %c0_i32_0 = arith.constant 0 : i32
    %2 = arith.cmpi ne, %1, %c0_i32_0 : i32
    scf.if %2 {
      %cst_10 = arith.constant 0.000000e+00 : f32
      %12 = vector.broadcast %cst_10 : f32 to vector<32x128xf32>
      %c0_11 = arith.constant 0 : index
      %c0_12 = arith.constant 0 : index
      %13 = vector.load %arg7[%c0_11, %c0_12] : memref<32x128xf32, #tpu.memory_space<vmem>>, vector<32x128xf32>
      tpu.vector_store %arg7[%c0_11, %c0_12], %12 {strides = array<i32>} : memref<32x128xf32, #tpu.memory_space<vmem>>, vector<32x128xf32>,
    } else {
    }
    %c0 = arith.constant 0 : index
    %c0_1 = arith.constant 0 : index
    %3 = vector.load %arg7[%c0, %c0_1] : memref<32x128xf32, #tpu.memory_space<vmem>>, vector<32x128xf32>
    %c0_2 = arith.constant 0 : index
    %c0_3 = arith.constant 0 : index
    %4 = vector.load %arg3[%c0_2, %c0_3] : memref<32x16xbf16, #tpu.memory_space<vmem>>, vector<32x16xbf16>
    %c0_4 = arith.constant 0 : index
    %c0_5 = arith.constant 0 : index
    %5 = vector.load %arg4[%c0_4, %c0_5] : memref<16x128xbf16, #tpu.memory_space<vmem>>, vector<16x128xbf16>
    %cst = arith.constant dense<0.000000e+00> : vector<32x128xf32>
    %6 = tpu.matmul %4, %5, %cst {dimension_numbers = #tpu.dot_dimension_numbers<[1], [0], [0], [1], [0, 0, 1, 1], [], []>} : vector<32x16xbf16>, vector<16x128xbf16>, vector<32x128xf32> -> vector<32x128xf32>
    %7 = arith.addf %3, %6 : vector<32x128xf32>
    %c0_6 = arith.constant 0 : index
    %c0_7 = arith.constant 0 : index
    %8 = vector.load %arg7[%c0_6, %c0_7] : memref<32x128xf32, #tpu.memory_space<vmem>>, vector<32x128xf32>
    tpu.vector_store %arg7[%c0_6, %c0_7], %7 {strides = array<i32>} : memref<32x128xf32, #tpu.memory_space<vmem>>, vector<32x128xf32>,
    %c0_i32_8 = arith.constant 0 : i32
    %9 = arith.cmpi eq, %arg2, %c0_i32_8 : i32
    %10 = arith.extui %9 : i1 to i32
    %c0_i32_9 = arith.constant 0 : i32
    %11 = arith.cmpi ne, %10, %c0_i32_9 : i32
    scf.if %11 {
      %c0_10 = arith.constant 0 : index
      %c0_11 = arith.constant 0 : index
      %12 = vector.load %arg7[%c0_10, %c0_11] : memref<32x128xf32, #tpu.memory_space<vmem>>, vector<32x128xf32>
      %c0_12 = arith.constant 0 : index
      %c0_13 = arith.constant 0 : index
      %13 = vector.load %arg5[%c0_12, %c0_13] : memref<1x128xf32, #tpu.memory_space<vmem>>, vector<1x128xf32>
      %14 = vector.broadcast %13 : vector<1x128xf32> to vector<32x128xf32>
      %15 = arith.addf %12, %14 : vector<32x128xf32>
      %16 = arith.truncf %15 : vector<32x128xf32> to vector<32x128xbf16>
      %c0_14 = arith.constant 0 : index
      %c0_15 = arith.constant 0 : index
      %17 = vector.load %arg6[%c0_14, %c0_15] : memref<32x128xbf16, #tpu.memory_space<vmem>>, vector<32x128xbf16>
      tpu.vector_store %arg6[%c0_14, %c0_15], %16 {strides = array<i32>} : memref<32x128xbf16, #tpu.memory_space<vmem>>, vector<32x128xbf16>,
    } else {
    }
    return
  }
  func.func @transform_0(%arg0: i32, %arg1: i32, %arg2: i32) -> (i32, i32) {
    %c0_i32 = arith.constant 0 : i32
    return %arg0, %arg2 : i32, i32
  }
  func.func @transform_1(%arg0: i32, %arg1: i32, %arg2: i32) -> (i32, i32) {
    %c0_i32 = arith.constant 0 : i32
    return %arg2, %arg1 : i32, i32
  }
  func.func @transform_2(%arg0: i32, %arg1: i32, %arg2: i32) -> (i32, i32) {
    %c0_i32 = arith.constant 0 : i32
    %c0_i32_0 = arith.constant 0 : i32
    return %c0_i32, %arg1 : i32, i32
  }
  func.func @transform_3(%arg0: i32, %arg1: i32, %arg2: i32) -> (i32, i32) {
    %c0_i32 = arith.constant 0 : i32
    return %arg0, %arg1 : i32, i32
  }
}

module attributes {stable_mosaic.version = 11 : i64} {
  func.func @_bn_stats_kernel(%arg0: i32, %arg1: memref<32x8xbf16, #tpu.memory_space<vmem>>, %arg2: memref<1x8xf32, #tpu.memory_space<vmem>>, %arg3: memref<1x8xf32, #tpu.memory_space<vmem>>) attributes {dimension_semantics = [#tpu.dimension_semantics<parallel>], iteration_bounds = array<i64: 1>, scalar_prefetch = 0 : i64, scratch_operands = 0 : i64, tpu.core_type = #tpu.core_type<tc>, window_params = [{transform_indices = @transform_0, window_bounds = array<i64: 32, 8>}, {transform_indices = @transform_1, window_bounds = array<i64: 1, 8>}, {transform_indices = @transform_2, window_bounds = array<i64: 1, 8>}]} {
    %c0 = arith.constant 0 : index
    %c0_0 = arith.constant 0 : index
    %0 = vector.load %arg1[%c0, %c0_0] : memref<32x8xbf16, #tpu.memory_space<vmem>>, vector<32x8xbf16>
    %1 = arith.extf %0 : vector<32x8xbf16> to vector<32x8xf32>
    %cst = arith.constant dense<0.000000e+00> : vector<8xf32>
    %2 = vector.multi_reduction <add>, %1, %cst [0] : vector<32x8xf32> to vector<8xf32>
    %3 = vector.shape_cast %2 : vector<8xf32> to vector<1x8xf32>
    %c0_1 = arith.constant 0 : index
    %c0_2 = arith.constant 0 : index
    %4 = vector.load %arg2[%c0_1, %c0_2] : memref<1x8xf32, #tpu.memory_space<vmem>>, vector<1x8xf32>
    tpu.vector_store %arg2[%c0_1, %c0_2], %3 {strides = array<i32>} : memref<1x8xf32, #tpu.memory_space<vmem>>, vector<1x8xf32>,
    %5 = arith.mulf %1, %1 : vector<32x8xf32>
    %cst_3 = arith.constant dense<0.000000e+00> : vector<8xf32>
    %6 = vector.multi_reduction <add>, %5, %cst_3 [0] : vector<32x8xf32> to vector<8xf32>
    %7 = vector.shape_cast %6 : vector<8xf32> to vector<1x8xf32>
    %c0_4 = arith.constant 0 : index
    %c0_5 = arith.constant 0 : index
    %8 = vector.load %arg3[%c0_4, %c0_5] : memref<1x8xf32, #tpu.memory_space<vmem>>, vector<1x8xf32>
    tpu.vector_store %arg3[%c0_4, %c0_5], %7 {strides = array<i32>} : memref<1x8xf32, #tpu.memory_space<vmem>>, vector<1x8xf32>,
    return
  }
  func.func @transform_0(%arg0: i32) -> (i32, i32) {
    %c0_i32 = arith.constant 0 : i32
    %c0_i32_0 = arith.constant 0 : i32
    return %arg0, %c0_i32 : i32, i32
  }
  func.func @transform_1(%arg0: i32) -> (i32, i32) {
    %c0_i32 = arith.constant 0 : i32
    %c0_i32_0 = arith.constant 0 : i32
    return %arg0, %c0_i32 : i32, i32
  }
  func.func @transform_2(%arg0: i32) -> (i32, i32) {
    %c0_i32 = arith.constant 0 : i32
    %c0_i32_0 = arith.constant 0 : i32
    return %arg0, %c0_i32 : i32, i32
  }
}

module attributes {stable_mosaic.version = 11 : i64} {
  func.func @_scale_shift_kernel(%arg0: i32, %arg1: memref<32x8xbf16, #tpu.memory_space<vmem>>, %arg2: memref<1x8xf32, #tpu.memory_space<vmem>>, %arg3: memref<1x8xf32, #tpu.memory_space<vmem>>, %arg4: memref<32x8xbf16, #tpu.memory_space<vmem>>) attributes {dimension_semantics = [#tpu.dimension_semantics<parallel>], iteration_bounds = array<i64: 1>, scalar_prefetch = 0 : i64, scratch_operands = 0 : i64, tpu.core_type = #tpu.core_type<tc>, window_params = [{transform_indices = @transform_0, window_bounds = array<i64: 32, 8>}, {pipeline_mode = #tpu.pipeline_mode<synchronous>, transform_indices = @transform_1, window_bounds = array<i64: 1, 8>}, {pipeline_mode = #tpu.pipeline_mode<synchronous>, transform_indices = @transform_2, window_bounds = array<i64: 1, 8>}, {transform_indices = @transform_3, window_bounds = array<i64: 32, 8>}]} {
    %c0 = arith.constant 0 : index
    %c0_0 = arith.constant 0 : index
    %0 = vector.load %arg1[%c0, %c0_0] : memref<32x8xbf16, #tpu.memory_space<vmem>>, vector<32x8xbf16>
    %1 = arith.extf %0 : vector<32x8xbf16> to vector<32x8xf32>
    %c0_1 = arith.constant 0 : index
    %c0_2 = arith.constant 0 : index
    %2 = vector.load %arg2[%c0_1, %c0_2] : memref<1x8xf32, #tpu.memory_space<vmem>>, vector<1x8xf32>
    %3 = vector.broadcast %2 : vector<1x8xf32> to vector<32x8xf32>
    %4 = arith.mulf %1, %3 : vector<32x8xf32>
    %c0_3 = arith.constant 0 : index
    %c0_4 = arith.constant 0 : index
    %5 = vector.load %arg3[%c0_3, %c0_4] : memref<1x8xf32, #tpu.memory_space<vmem>>, vector<1x8xf32>
    %6 = vector.broadcast %5 : vector<1x8xf32> to vector<32x8xf32>
    %7 = arith.addf %4, %6 : vector<32x8xf32>
    %cst = arith.constant 0.000000e+00 : f32
    %8 = vector.broadcast %cst : f32 to vector<32x8xf32>
    %9 = arith.maximumf %7, %8 : vector<32x8xf32>
    %10 = arith.truncf %9 : vector<32x8xf32> to vector<32x8xbf16>
    %c0_5 = arith.constant 0 : index
    %c0_6 = arith.constant 0 : index
    %11 = vector.load %arg4[%c0_5, %c0_6] : memref<32x8xbf16, #tpu.memory_space<vmem>>, vector<32x8xbf16>
    tpu.vector_store %arg4[%c0_5, %c0_6], %10 {strides = array<i32>} : memref<32x8xbf16, #tpu.memory_space<vmem>>, vector<32x8xbf16>,
    return
  }
  func.func @transform_0(%arg0: i32) -> (i32, i32) {
    %c0_i32 = arith.constant 0 : i32
    %c0_i32_0 = arith.constant 0 : i32
    return %arg0, %c0_i32 : i32, i32
  }
  func.func @transform_1(%arg0: i32) -> (i32, i32) {
    %c0_i32 = arith.constant 0 : i32
    %c0_i32_0 = arith.constant 0 : i32
    %c0_i32_1 = arith.constant 0 : i32
    return %c0_i32, %c0_i32_0 : i32, i32
  }
  func.func @transform_2(%arg0: i32) -> (i32, i32) {
    %c0_i32 = arith.constant 0 : i32
    %c0_i32_0 = arith.constant 0 : i32
    %c0_i32_1 = arith.constant 0 : i32
    return %c0_i32, %c0_i32_0 : i32, i32
  }
  func.func @transform_3(%arg0: i32) -> (i32, i32) {
    %c0_i32 = arith.constant 0 : i32
    %c0_i32_0 = arith.constant 0 : i32
    return %arg0, %c0_i32 : i32, i32
  }
}

module attributes {stable_mosaic.version = 11 : i64} {
  func.func @_flash_attn_kernel(%arg0: i32, %arg1: i32, %arg2: i32, %arg3: memref<1x16x8xbf16, #tpu.memory_space<vmem>>, %arg4: memref<1x16x8xbf16, #tpu.memory_space<vmem>>, %arg5: memref<1x16x8xbf16, #tpu.memory_space<vmem>>, %arg6: memref<1x16x8xbf16, #tpu.memory_space<vmem>>, %arg7: memref<16x1xf32, #tpu.memory_space<vmem>>, %arg8: memref<16x1xf32, #tpu.memory_space<vmem>>, %arg9: memref<16x8xf32, #tpu.memory_space<vmem>>) attributes {dimension_semantics = [#tpu.dimension_semantics<parallel>, #tpu.dimension_semantics<parallel>, #tpu.dimension_semantics<arbitrary>], iteration_bounds = array<i64: 2, 1, 1>, scalar_prefetch = 0 : i64, scratch_operands = 3 : i64, tpu.core_type = #tpu.core_type<tc>, window_params = [{transform_indices = @transform_0, window_bounds = array<i64: 1, 16, 8>}, {transform_indices = @transform_1, window_bounds = array<i64: 1, 16, 8>}, {transform_indices = @transform_2, window_bounds = array<i64: 1, 16, 8>}, {transform_indices = @transform_3, window_bounds = array<i64: 1, 16, 8>}]} {
    %c0_i32 = arith.constant 0 : i32
    %0 = arith.cmpi eq, %arg2, %c0_i32 : i32
    %1 = arith.extui %0 : i1 to i32
    %c0_i32_0 = arith.constant 0 : i32
    %2 = arith.cmpi ne, %1, %c0_i32_0 : i32
    scf.if %2 {
      %cst_27 = arith.constant 0xFF800000 : f32
      %38 = vector.broadcast %cst_27 : f32 to vector<16x1xf32>
      %c0_28 = arith.constant 0 : index
      %c0_29 = arith.constant 0 : index
      %39 = vector.load %arg7[%c0_28, %c0_29] : memref<16x1xf32, #tpu.memory_space<vmem>>, vector<16x1xf32>
      tpu.vector_store %arg7[%c0_28, %c0_29], %38 {strides = array<i32>} : memref<16x1xf32, #tpu.memory_space<vmem>>, vector<16x1xf32>,
      %cst_30 = arith.constant 0.000000e+00 : f32
      %40 = vector.broadcast %cst_30 : f32 to vector<16x1xf32>
      %c0_31 = arith.constant 0 : index
      %c0_32 = arith.constant 0 : index
      %41 = vector.load %arg8[%c0_31, %c0_32] : memref<16x1xf32, #tpu.memory_space<vmem>>, vector<16x1xf32>
      tpu.vector_store %arg8[%c0_31, %c0_32], %40 {strides = array<i32>} : memref<16x1xf32, #tpu.memory_space<vmem>>, vector<16x1xf32>,
      %cst_33 = arith.constant 0.000000e+00 : f32
      %42 = vector.broadcast %cst_33 : f32 to vector<16x8xf32>
      %c0_34 = arith.constant 0 : index
      %c0_35 = arith.constant 0 : index
      %43 = vector.load %arg9[%c0_34, %c0_35] : memref<16x8xf32, #tpu.memory_space<vmem>>, vector<16x8xf32>
      tpu.vector_store %arg9[%c0_34, %c0_35], %42 {strides = array<i32>} : memref<16x8xf32, #tpu.memory_space<vmem>>, vector<16x8xf32>,
    } else {
    }
    %c0 = arith.constant 0 : index
    %c0_1 = arith.constant 0 : index
    %c0_2 = arith.constant 0 : index
    %3 = vector.load %arg3[%c0, %c0_1, %c0_2] : memref<1x16x8xbf16, #tpu.memory_space<vmem>>, vector<1x16x8xbf16>
    %4 = vector.shape_cast %3 : vector<1x16x8xbf16> to vector<16x8xbf16>
    %c0_3 = arith.constant 0 : index
    %c0_4 = arith.constant 0 : index
    %c0_5 = arith.constant 0 : index
    %5 = vector.load %arg4[%c0_3, %c0_4, %c0_5] : memref<1x16x8xbf16, #tpu.memory_space<vmem>>, vector<1x16x8xbf16>
    %6 = vector.shape_cast %5 : vector<1x16x8xbf16> to vector<16x8xbf16>
    %c0_6 = arith.constant 0 : index
    %c0_7 = arith.constant 0 : index
    %c0_8 = arith.constant 0 : index
    %7 = vector.load %arg5[%c0_6, %c0_7, %c0_8] : memref<1x16x8xbf16, #tpu.memory_space<vmem>>, vector<1x16x8xbf16>
    %8 = vector.shape_cast %7 : vector<1x16x8xbf16> to vector<16x8xbf16>
    %cst = arith.constant dense<0.000000e+00> : vector<16x16xf32>
    %9 = tpu.matmul %4, %6, %cst {dimension_numbers = #tpu.dot_dimension_numbers<[1], [1], [0], [0], [0, 0, 1, 0], [], []>} : vector<16x8xbf16>, vector<16x8xbf16>, vector<16x16xf32> -> vector<16x16xf32>
    %cst_9 = arith.constant 0.353553385 : f32
    %10 = vector.broadcast %cst_9 : f32 to vector<16x16xf32>
    %11 = arith.mulf %9, %10 : vector<16x16xf32>
    %c0_10 = arith.constant 0 : index
    %c0_11 = arith.constant 0 : index
    %12 = vector.load %arg7[%c0_10, %c0_11] : memref<16x1xf32, #tpu.memory_space<vmem>>, vector<16x1xf32>
    %cst_12 = arith.constant dense<0xFF800000> : vector<16xf32>
    %13 = vector.multi_reduction <maximumf>, %11, %cst_12 [1] : vector<16x16xf32> to vector<16xf32>
    %14 = vector.shape_cast %13 : vector<16xf32> to vector<16x1xf32>
    %15 = arith.maximumf %12, %14 : vector<16x1xf32>
    %16 = arith.subf %12, %15 : vector<16x1xf32>
    %17 = math.exp %16 : vector<16x1xf32>
    %18 = vector.broadcast %15 : vector<16x1xf32> to vector<16x16xf32>
    %19 = arith.subf %11, %18 : vector<16x16xf32>
    %20 = math.exp %19 : vector<16x16xf32>
    %c0_13 = arith.constant 0 : index
    %c0_14 = arith.constant 0 : index
    %21 = vector.load %arg8[%c0_13, %c0_14] : memref<16x1xf32, #tpu.memory_space<vmem>>, vector<16x1xf32>
    %22 = arith.mulf %17, %21 : vector<16x1xf32>
    %cst_15 = arith.constant dense<0.000000e+00> : vector<16xf32>
    %23 = vector.multi_reduction <add>, %20, %cst_15 [1] : vector<16x16xf32> to vector<16xf32>
    %24 = vector.shape_cast %23 : vector<16xf32> to vector<16x1xf32>
    %25 = arith.addf %22, %24 : vector<16x1xf32>
    %c0_16 = arith.constant 0 : index
    %c0_17 = arith.constant 0 : index
    %26 = vector.load %arg8[%c0_16, %c0_17] : memref<16x1xf32, #tpu.memory_space<vmem>>, vector<16x1xf32>
    tpu.vector_store %arg8[%c0_16, %c0_17], %25 {strides = array<i32>} : memref<16x1xf32, #tpu.memory_space<vmem>>, vector<16x1xf32>,
    %c0_18 = arith.constant 0 : index
    %c0_19 = arith.constant 0 : index
    %27 = vector.load %arg9[%c0_18, %c0_19] : memref<16x8xf32, #tpu.memory_space<vmem>>, vector<16x8xf32>
    %28 = vector.broadcast %17 : vector<16x1xf32> to vector<16x8xf32>
    %29 = arith.mulf %28, %27 : vector<16x8xf32>
    %30 = arith.truncf %20 : vector<16x16xf32> to vector<16x16xbf16>
    %cst_20 = arith.constant dense<0.000000e+00> : vector<16x8xf32>
    %31 = tpu.matmul %30, %8, %cst_20 {dimension_numbers = #tpu.dot_dimension_numbers<[1], [0], [0], [1], [0, 0, 1, 1], [], []>} : vector<16x16xbf16>, vector<16x8xbf16>, vector<16x8xf32> -> vector<16x8xf32>
    %32 = arith.addf %29, %31 : vector<16x8xf32>
    %c0_21 = arith.constant 0 : index
    %c0_22 = arith.constant 0 : index
    %33 = vector.load %arg9[%c0_21, %c0_22] : memref<16x8xf32, #tpu.memory_space<vmem>>, vector<16x8xf32>
    tpu.vector_store %arg9[%c0_21, %c0_22], %32 {strides = array<i32>} : memref<16x8xf32, #tpu.memory_space<vmem>>, vector<16x8xf32>,
    %c0_23 = arith.constant 0 : index
    %c0_24 = arith.constant 0 : index
    %34 = vector.load %arg7[%c0_23, %c0_24] : memref<16x1xf32, #tpu.memory_space<vmem>>, vector<16x1xf32>
    tpu.vector_store %arg7[%c0_23, %c0_24], %15 {strides = array<i32>} : memref<16x1xf32, #tpu.memory_space<vmem>>, vector<16x1xf32>,
    %c0_i32_25 = arith.constant 0 : i32
    %35 = arith.cmpi eq, %arg2, %c0_i32_25 : i32
    %36 = arith.extui %35 : i1 to i32
    %c0_i32_26 = arith.constant 0 : i32
    %37 = arith.cmpi ne, %36, %c0_i32_26 : i32
    scf.if %37 {
      %c0_27 = arith.constant 0 : index
      %c0_28 = arith.constant 0 : index
      %38 = vector.load %arg9[%c0_27, %c0_28] : memref<16x8xf32, #tpu.memory_space<vmem>>, vector<16x8xf32>
      %c0_29 = arith.constant 0 : index
      %c0_30 = arith.constant 0 : index
      %39 = vector.load %arg8[%c0_29, %c0_30] : memref<16x1xf32, #tpu.memory_space<vmem>>, vector<16x1xf32>
      %40 = tpu.reciprocal %39 {approx = true} : vector<16x1xf32> -> vector<16x1xf32>
      %41 = vector.broadcast %40 : vector<16x1xf32> to vector<16x8xf32>
      %42 = arith.mulf %38, %41 : vector<16x8xf32>
      %43 = arith.truncf %42 : vector<16x8xf32> to vector<16x8xbf16>
      %c0_31 = arith.constant 0 : index
      %c0_32 = arith.constant 0 : index
      %c0_33 = arith.constant 0 : index
      %44 = vector.load %arg6[%c0_31, %c0_32, %c0_33] : memref<1x16x8xbf16, #tpu.memory_space<vmem>>, vector<1x16x8xbf16>
      %45 = vector.shape_cast %44 : vector<1x16x8xbf16> to vector<16x8xbf16>
      %46 = vector.shape_cast %43 : vector<16x8xbf16> to vector<1x16x8xbf16>
      tpu.vector_store %arg6[%c0_31, %c0_32, %c0_33], %46 {strides = array<i32>} : memref<1x16x8xbf16, #tpu.memory_space<vmem>>, vector<1x16x8xbf16>,
    } else {
    }
    return
  }
  func.func @transform_0(%arg0: i32, %arg1: i32, %arg2: i32) -> (i32, i32, i32) {
    %c0_i32 = arith.constant 0 : i32
    %c0_i32_0 = arith.constant 0 : i32
    return %arg0, %arg1, %c0_i32 : i32, i32, i32
  }
  func.func @transform_1(%arg0: i32, %arg1: i32, %arg2: i32) -> (i32, i32, i32) {
    %c0_i32 = arith.constant 0 : i32
    %c0_i32_0 = arith.constant 0 : i32
    return %arg0, %arg2, %c0_i32 : i32, i32, i32
  }
  func.func @transform_2(%arg0: i32, %arg1: i32, %arg2: i32) -> (i32, i32, i32) {
    %c0_i32 = arith.constant 0 : i32
    %c0_i32_0 = arith.constant 0 : i32
    return %arg0, %arg2, %c0_i32 : i32, i32, i32
  }
  func.func @transform_3(%arg0: i32, %arg1: i32, %arg2: i32) -> (i32, i32, i32) {
    %c0_i32 = arith.constant 0 : i32
    %c0_i32_0 = arith.constant 0 : i32
    return %arg0, %arg1, %c0_i32 : i32, i32, i32
  }
}

module attributes {stable_mosaic.version = 11 : i64} {
  func.func @_matmul_kernel(%arg0: i32, %arg1: i32, %arg2: i32, %arg3: memref<32x8xbf16, #tpu.memory_space<vmem>>, %arg4: memref<8x128xbf16, #tpu.memory_space<vmem>>, %arg5: memref<1x128xf32, #tpu.memory_space<vmem>>, %arg6: memref<32x128xbf16, #tpu.memory_space<vmem>>, %arg7: memref<32x128xf32, #tpu.memory_space<vmem>>) attributes {dimension_semantics = [#tpu.dimension_semantics<parallel>, #tpu.dimension_semantics<parallel>, #tpu.dimension_semantics<arbitrary>], iteration_bounds = array<i64: 1, 1, 1>, scalar_prefetch = 0 : i64, scratch_operands = 1 : i64, tpu.core_type = #tpu.core_type<tc>, window_params = [{transform_indices = @transform_0, window_bounds = array<i64: 32, 8>}, {transform_indices = @transform_1, window_bounds = array<i64: 8, 128>}, {transform_indices = @transform_2, window_bounds = array<i64: 1, 128>}, {transform_indices = @transform_3, window_bounds = array<i64: 32, 128>}]} {
    %c0_i32 = arith.constant 0 : i32
    %0 = arith.cmpi eq, %arg2, %c0_i32 : i32
    %1 = arith.extui %0 : i1 to i32
    %c0_i32_0 = arith.constant 0 : i32
    %2 = arith.cmpi ne, %1, %c0_i32_0 : i32
    scf.if %2 {
      %cst_10 = arith.constant 0.000000e+00 : f32
      %12 = vector.broadcast %cst_10 : f32 to vector<32x128xf32>
      %c0_11 = arith.constant 0 : index
      %c0_12 = arith.constant 0 : index
      %13 = vector.load %arg7[%c0_11, %c0_12] : memref<32x128xf32, #tpu.memory_space<vmem>>, vector<32x128xf32>
      tpu.vector_store %arg7[%c0_11, %c0_12], %12 {strides = array<i32>} : memref<32x128xf32, #tpu.memory_space<vmem>>, vector<32x128xf32>,
    } else {
    }
    %c0 = arith.constant 0 : index
    %c0_1 = arith.constant 0 : index
    %3 = vector.load %arg7[%c0, %c0_1] : memref<32x128xf32, #tpu.memory_space<vmem>>, vector<32x128xf32>
    %c0_2 = arith.constant 0 : index
    %c0_3 = arith.constant 0 : index
    %4 = vector.load %arg3[%c0_2, %c0_3] : memref<32x8xbf16, #tpu.memory_space<vmem>>, vector<32x8xbf16>
    %c0_4 = arith.constant 0 : index
    %c0_5 = arith.constant 0 : index
    %5 = vector.load %arg4[%c0_4, %c0_5] : memref<8x128xbf16, #tpu.memory_space<vmem>>, vector<8x128xbf16>
    %cst = arith.constant dense<0.000000e+00> : vector<32x128xf32>
    %6 = tpu.matmul %4, %5, %cst {dimension_numbers = #tpu.dot_dimension_numbers<[1], [0], [0], [1], [0, 0, 1, 1], [], []>} : vector<32x8xbf16>, vector<8x128xbf16>, vector<32x128xf32> -> vector<32x128xf32>
    %7 = arith.addf %3, %6 : vector<32x128xf32>
    %c0_6 = arith.constant 0 : index
    %c0_7 = arith.constant 0 : index
    %8 = vector.load %arg7[%c0_6, %c0_7] : memref<32x128xf32, #tpu.memory_space<vmem>>, vector<32x128xf32>
    tpu.vector_store %arg7[%c0_6, %c0_7], %7 {strides = array<i32>} : memref<32x128xf32, #tpu.memory_space<vmem>>, vector<32x128xf32>,
    %c0_i32_8 = arith.constant 0 : i32
    %9 = arith.cmpi eq, %arg2, %c0_i32_8 : i32
    %10 = arith.extui %9 : i1 to i32
    %c0_i32_9 = arith.constant 0 : i32
    %11 = arith.cmpi ne, %10, %c0_i32_9 : i32
    scf.if %11 {
      %c0_10 = arith.constant 0 : index
      %c0_11 = arith.constant 0 : index
      %12 = vector.load %arg7[%c0_10, %c0_11] : memref<32x128xf32, #tpu.memory_space<vmem>>, vector<32x128xf32>
      %c0_12 = arith.constant 0 : index
      %c0_13 = arith.constant 0 : index
      %13 = vector.load %arg5[%c0_12, %c0_13] : memref<1x128xf32, #tpu.memory_space<vmem>>, vector<1x128xf32>
      %14 = vector.broadcast %13 : vector<1x128xf32> to vector<32x128xf32>
      %15 = arith.addf %12, %14 : vector<32x128xf32>
      %16 = arith.truncf %15 : vector<32x128xf32> to vector<32x128xbf16>
      %c0_14 = arith.constant 0 : index
      %c0_15 = arith.constant 0 : index
      %17 = vector.load %arg6[%c0_14, %c0_15] : memref<32x128xbf16, #tpu.memory_space<vmem>>, vector<32x128xbf16>
      tpu.vector_store %arg6[%c0_14, %c0_15], %16 {strides = array<i32>} : memref<32x128xbf16, #tpu.memory_space<vmem>>, vector<32x128xbf16>,
    } else {
    }
    return
  }
  func.func @transform_0(%arg0: i32, %arg1: i32, %arg2: i32) -> (i32, i32) {
    %c0_i32 = arith.constant 0 : i32
    return %arg0, %arg2 : i32, i32
  }
  func.func @transform_1(%arg0: i32, %arg1: i32, %arg2: i32) -> (i32, i32) {
    %c0_i32 = arith.constant 0 : i32
    return %arg2, %arg1 : i32, i32
  }
  func.func @transform_2(%arg0: i32, %arg1: i32, %arg2: i32) -> (i32, i32) {
    %c0_i32 = arith.constant 0 : i32
    %c0_i32_0 = arith.constant 0 : i32
    return %c0_i32, %arg1 : i32, i32
  }
  func.func @transform_3(%arg0: i32, %arg1: i32, %arg2: i32) -> (i32, i32) {
    %c0_i32 = arith.constant 0 : i32
    return %arg0, %arg1 : i32, i32
  }
}

module attributes {stable_mosaic.version = 11 : i64} {
  func.func @_scale_shift_kernel(%arg0: i32, %arg1: memref<32x16xbf16, #tpu.memory_space<vmem>>, %arg2: memref<1x16xf32, #tpu.memory_space<vmem>>, %arg3: memref<1x16xf32, #tpu.memory_space<vmem>>, %arg4: memref<32x16xbf16, #tpu.memory_space<vmem>>) attributes {dimension_semantics = [#tpu.dimension_semantics<parallel>], iteration_bounds = array<i64: 1>, scalar_prefetch = 0 : i64, scratch_operands = 0 : i64, tpu.core_type = #tpu.core_type<tc>, window_params = [{transform_indices = @transform_0, window_bounds = array<i64: 32, 16>}, {pipeline_mode = #tpu.pipeline_mode<synchronous>, transform_indices = @transform_1, window_bounds = array<i64: 1, 16>}, {pipeline_mode = #tpu.pipeline_mode<synchronous>, transform_indices = @transform_2, window_bounds = array<i64: 1, 16>}, {transform_indices = @transform_3, window_bounds = array<i64: 32, 16>}]} {
    %c0 = arith.constant 0 : index
    %c0_0 = arith.constant 0 : index
    %0 = vector.load %arg1[%c0, %c0_0] : memref<32x16xbf16, #tpu.memory_space<vmem>>, vector<32x16xbf16>
    %1 = arith.extf %0 : vector<32x16xbf16> to vector<32x16xf32>
    %c0_1 = arith.constant 0 : index
    %c0_2 = arith.constant 0 : index
    %2 = vector.load %arg2[%c0_1, %c0_2] : memref<1x16xf32, #tpu.memory_space<vmem>>, vector<1x16xf32>
    %3 = vector.broadcast %2 : vector<1x16xf32> to vector<32x16xf32>
    %4 = arith.mulf %1, %3 : vector<32x16xf32>
    %c0_3 = arith.constant 0 : index
    %c0_4 = arith.constant 0 : index
    %5 = vector.load %arg3[%c0_3, %c0_4] : memref<1x16xf32, #tpu.memory_space<vmem>>, vector<1x16xf32>
    %6 = vector.broadcast %5 : vector<1x16xf32> to vector<32x16xf32>
    %7 = arith.addf %4, %6 : vector<32x16xf32>
    %cst = arith.constant 0.000000e+00 : f32
    %8 = vector.broadcast %cst : f32 to vector<32x16xf32>
    %9 = arith.maximumf %7, %8 : vector<32x16xf32>
    %10 = arith.truncf %9 : vector<32x16xf32> to vector<32x16xbf16>
    %c0_5 = arith.constant 0 : index
    %c0_6 = arith.constant 0 : index
    %11 = vector.load %arg4[%c0_5, %c0_6] : memref<32x16xbf16, #tpu.memory_space<vmem>>, vector<32x16xbf16>
    tpu.vector_store %arg4[%c0_5, %c0_6], %10 {strides = array<i32>} : memref<32x16xbf16, #tpu.memory_space<vmem>>, vector<32x16xbf16>,
    return
  }
  func.func @transform_0(%arg0: i32) -> (i32, i32) {
    %c0_i32 = arith.constant 0 : i32
    %c0_i32_0 = arith.constant 0 : i32
    return %arg0, %c0_i32 : i32, i32
  }
  func.func @transform_1(%arg0: i32) -> (i32, i32) {
    %c0_i32 = arith.constant 0 : i32
    %c0_i32_0 = arith.constant 0 : i32
    %c0_i32_1 = arith.constant 0 : i32
    return %c0_i32, %c0_i32_0 : i32, i32
  }
  func.func @transform_2(%arg0: i32) -> (i32, i32) {
    %c0_i32 = arith.constant 0 : i32
    %c0_i32_0 = arith.constant 0 : i32
    %c0_i32_1 = arith.constant 0 : i32
    return %c0_i32, %c0_i32_0 : i32, i32
  }
  func.func @transform_3(%arg0: i32) -> (i32, i32) {
    %c0_i32 = arith.constant 0 : i32
    %c0_i32_0 = arith.constant 0 : i32
    return %arg0, %c0_i32 : i32, i32
  }
}

module attributes {stable_mosaic.version = 11 : i64} {
  func.func @_matmul_kernel(%arg0: i32, %arg1: i32, %arg2: i32, %arg3: memref<32x32xbf16, #tpu.memory_space<vmem>>, %arg4: memref<32x128xbf16, #tpu.memory_space<vmem>>, %arg5: memref<1x128xf32, #tpu.memory_space<vmem>>, %arg6: memref<32x128xbf16, #tpu.memory_space<vmem>>, %arg7: memref<32x128xf32, #tpu.memory_space<vmem>>) attributes {dimension_semantics = [#tpu.dimension_semantics<parallel>, #tpu.dimension_semantics<parallel>, #tpu.dimension_semantics<arbitrary>], iteration_bounds = array<i64: 1, 1, 1>, scalar_prefetch = 0 : i64, scratch_operands = 1 : i64, tpu.core_type = #tpu.core_type<tc>, window_params = [{transform_indices = @transform_0, window_bounds = array<i64: 32, 32>}, {transform_indices = @transform_1, window_bounds = array<i64: 32, 128>}, {transform_indices = @transform_2, window_bounds = array<i64: 1, 128>}, {transform_indices = @transform_3, window_bounds = array<i64: 32, 128>}]} {
    %c0_i32 = arith.constant 0 : i32
    %0 = arith.cmpi eq, %arg2, %c0_i32 : i32
    %1 = arith.extui %0 : i1 to i32
    %c0_i32_0 = arith.constant 0 : i32
    %2 = arith.cmpi ne, %1, %c0_i32_0 : i32
    scf.if %2 {
      %cst_10 = arith.constant 0.000000e+00 : f32
      %12 = vector.broadcast %cst_10 : f32 to vector<32x128xf32>
      %c0_11 = arith.constant 0 : index
      %c0_12 = arith.constant 0 : index
      %13 = vector.load %arg7[%c0_11, %c0_12] : memref<32x128xf32, #tpu.memory_space<vmem>>, vector<32x128xf32>
      tpu.vector_store %arg7[%c0_11, %c0_12], %12 {strides = array<i32>} : memref<32x128xf32, #tpu.memory_space<vmem>>, vector<32x128xf32>,
    } else {
    }
    %c0 = arith.constant 0 : index
    %c0_1 = arith.constant 0 : index
    %3 = vector.load %arg7[%c0, %c0_1] : memref<32x128xf32, #tpu.memory_space<vmem>>, vector<32x128xf32>
    %c0_2 = arith.constant 0 : index
    %c0_3 = arith.constant 0 : index
    %4 = vector.load %arg3[%c0_2, %c0_3] : memref<32x32xbf16, #tpu.memory_space<vmem>>, vector<32x32xbf16>
    %c0_4 = arith.constant 0 : index
    %c0_5 = arith.constant 0 : index
    %5 = vector.load %arg4[%c0_4, %c0_5] : memref<32x128xbf16, #tpu.memory_space<vmem>>, vector<32x128xbf16>
    %cst = arith.constant dense<0.000000e+00> : vector<32x128xf32>
    %6 = tpu.matmul %4, %5, %cst {dimension_numbers = #tpu.dot_dimension_numbers<[1], [0], [0], [1], [0, 0, 1, 1], [], []>} : vector<32x32xbf16>, vector<32x128xbf16>, vector<32x128xf32> -> vector<32x128xf32>
    %7 = arith.addf %3, %6 : vector<32x128xf32>
    %c0_6 = arith.constant 0 : index
    %c0_7 = arith.constant 0 : index
    %8 = vector.load %arg7[%c0_6, %c0_7] : memref<32x128xf32, #tpu.memory_space<vmem>>, vector<32x128xf32>
    tpu.vector_store %arg7[%c0_6, %c0_7], %7 {strides = array<i32>} : memref<32x128xf32, #tpu.memory_space<vmem>>, vector<32x128xf32>,
    %c0_i32_8 = arith.constant 0 : i32
    %9 = arith.cmpi eq, %arg2, %c0_i32_8 : i32
    %10 = arith.extui %9 : i1 to i32
    %c0_i32_9 = arith.constant 0 : i32
    %11 = arith.cmpi ne, %10, %c0_i32_9 : i32
    scf.if %11 {
      %c0_10 = arith.constant 0 : index
      %c0_11 = arith.constant 0 : index
      %12 = vector.load %arg7[%c0_10, %c0_11] : memref<32x128xf32, #tpu.memory_space<vmem>>, vector<32x128xf32>
      %c0_12 = arith.constant 0 : index
      %c0_13 = arith.constant 0 : index
      %13 = vector.load %arg5[%c0_12, %c0_13] : memref<1x128xf32, #tpu.memory_space<vmem>>, vector<1x128xf32>
      %14 = vector.broadcast %13 : vector<1x128xf32> to vector<32x128xf32>
      %15 = arith.addf %12, %14 : vector<32x128xf32>
      %16 = arith.truncf %15 : vector<32x128xf32> to vector<32x128xbf16>
      %c0_14 = arith.constant 0 : index
      %c0_15 = arith.constant 0 : index
      %17 = vector.load %arg6[%c0_14, %c0_15] : memref<32x128xbf16, #tpu.memory_space<vmem>>, vector<32x128xbf16>
      tpu.vector_store %arg6[%c0_14, %c0_15], %16 {strides = array<i32>} : memref<32x128xbf16, #tpu.memory_space<vmem>>, vector<32x128xbf16>,
    } else {
    }
    return
  }
  func.func @transform_0(%arg0: i32, %arg1: i32, %arg2: i32) -> (i32, i32) {
    %c0_i32 = arith.constant 0 : i32
    return %arg0, %arg2 : i32, i32
  }
  func.func @transform_1(%arg0: i32, %arg1: i32, %arg2: i32) -> (i32, i32) {
    %c0_i32 = arith.constant 0 : i32
    return %arg2, %arg1 : i32, i32
  }
  func.func @transform_2(%arg0: i32, %arg1: i32, %arg2: i32) -> (i32, i32) {
    %c0_i32 = arith.constant 0 : i32
    %c0_i32_0 = arith.constant 0 : i32
    return %c0_i32, %arg1 : i32, i32
  }
  func.func @transform_3(%arg0: i32, %arg1: i32, %arg2: i32) -> (i32, i32) {
    %c0_i32 = arith.constant 0 : i32
    return %arg0, %arg1 : i32, i32
  }
}

module attributes {stable_mosaic.version = 11 : i64} {
  func.func @_matmul_kernel(%arg0: i32, %arg1: i32, %arg2: i32, %arg3: memref<32x16xbf16, #tpu.memory_space<vmem>>, %arg4: memref<16x128xbf16, #tpu.memory_space<vmem>>, %arg5: memref<1x128xf32, #tpu.memory_space<vmem>>, %arg6: memref<32x128xf32, #tpu.memory_space<vmem>>, %arg7: memref<32x128xf32, #tpu.memory_space<vmem>>) attributes {dimension_semantics = [#tpu.dimension_semantics<parallel>, #tpu.dimension_semantics<parallel>, #tpu.dimension_semantics<arbitrary>], iteration_bounds = array<i64: 1, 1, 1>, scalar_prefetch = 0 : i64, scratch_operands = 1 : i64, tpu.core_type = #tpu.core_type<tc>, window_params = [{transform_indices = @transform_0, window_bounds = array<i64: 32, 16>}, {transform_indices = @transform_1, window_bounds = array<i64: 16, 128>}, {transform_indices = @transform_2, window_bounds = array<i64: 1, 128>}, {transform_indices = @transform_3, window_bounds = array<i64: 32, 128>}]} {
    %c0_i32 = arith.constant 0 : i32
    %0 = arith.cmpi eq, %arg2, %c0_i32 : i32
    %1 = arith.extui %0 : i1 to i32
    %c0_i32_0 = arith.constant 0 : i32
    %2 = arith.cmpi ne, %1, %c0_i32_0 : i32
    scf.if %2 {
      %cst_10 = arith.constant 0.000000e+00 : f32
      %12 = vector.broadcast %cst_10 : f32 to vector<32x128xf32>
      %c0_11 = arith.constant 0 : index
      %c0_12 = arith.constant 0 : index
      %13 = vector.load %arg7[%c0_11, %c0_12] : memref<32x128xf32, #tpu.memory_space<vmem>>, vector<32x128xf32>
      tpu.vector_store %arg7[%c0_11, %c0_12], %12 {strides = array<i32>} : memref<32x128xf32, #tpu.memory_space<vmem>>, vector<32x128xf32>,
    } else {
    }
    %c0 = arith.constant 0 : index
    %c0_1 = arith.constant 0 : index
    %3 = vector.load %arg7[%c0, %c0_1] : memref<32x128xf32, #tpu.memory_space<vmem>>, vector<32x128xf32>
    %c0_2 = arith.constant 0 : index
    %c0_3 = arith.constant 0 : index
    %4 = vector.load %arg3[%c0_2, %c0_3] : memref<32x16xbf16, #tpu.memory_space<vmem>>, vector<32x16xbf16>
    %c0_4 = arith.constant 0 : index
    %c0_5 = arith.constant 0 : index
    %5 = vector.load %arg4[%c0_4, %c0_5] : memref<16x128xbf16, #tpu.memory_space<vmem>>, vector<16x128xbf16>
    %cst = arith.constant dense<0.000000e+00> : vector<32x128xf32>
    %6 = tpu.matmul %4, %5, %cst {dimension_numbers = #tpu.dot_dimension_numbers<[1], [0], [0], [1], [0, 0, 1, 1], [], []>} : vector<32x16xbf16>, vector<16x128xbf16>, vector<32x128xf32> -> vector<32x128xf32>
    %7 = arith.addf %3, %6 : vector<32x128xf32>
    %c0_6 = arith.constant 0 : index
    %c0_7 = arith.constant 0 : index
    %8 = vector.load %arg7[%c0_6, %c0_7] : memref<32x128xf32, #tpu.memory_space<vmem>>, vector<32x128xf32>
    tpu.vector_store %arg7[%c0_6, %c0_7], %7 {strides = array<i32>} : memref<32x128xf32, #tpu.memory_space<vmem>>, vector<32x128xf32>,
    %c0_i32_8 = arith.constant 0 : i32
    %9 = arith.cmpi eq, %arg2, %c0_i32_8 : i32
    %10 = arith.extui %9 : i1 to i32
    %c0_i32_9 = arith.constant 0 : i32
    %11 = arith.cmpi ne, %10, %c0_i32_9 : i32
    scf.if %11 {
      %c0_10 = arith.constant 0 : index
      %c0_11 = arith.constant 0 : index
      %12 = vector.load %arg7[%c0_10, %c0_11] : memref<32x128xf32, #tpu.memory_space<vmem>>, vector<32x128xf32>
      %c0_12 = arith.constant 0 : index
      %c0_13 = arith.constant 0 : index
      %13 = vector.load %arg5[%c0_12, %c0_13] : memref<1x128xf32, #tpu.memory_space<vmem>>, vector<1x128xf32>
      %14 = vector.broadcast %13 : vector<1x128xf32> to vector<32x128xf32>
      %15 = arith.addf %12, %14 : vector<32x128xf32>
      %c0_14 = arith.constant 0 : index
      %c0_15 = arith.constant 0 : index
      %16 = vector.load %arg6[%c0_14, %c0_15] : memref<32x128xf32, #tpu.memory_space<vmem>>, vector<32x128xf32>
      tpu.vector_store %arg6[%c0_14, %c0_15], %15 {strides = array<i32>} : memref<32x128xf32, #tpu.memory_space<vmem>>, vector<32x128xf32>,
    } else {
    }
    return
  }
  func.func @transform_0(%arg0: i32, %arg1: i32, %arg2: i32) -> (i32, i32) {
    %c0_i32 = arith.constant 0 : i32
    return %arg0, %arg2 : i32, i32
  }
  func.func @transform_1(%arg0: i32, %arg1: i32, %arg2: i32) -> (i32, i32) {
    %c0_i32 = arith.constant 0 : i32
    return %arg2, %arg1 : i32, i32
  }
  func.func @transform_2(%arg0: i32, %arg1: i32, %arg2: i32) -> (i32, i32) {
    %c0_i32 = arith.constant 0 : i32
    %c0_i32_0 = arith.constant 0 : i32
    return %c0_i32, %arg1 : i32, i32
  }
  func.func @transform_3(%arg0: i32, %arg1: i32, %arg2: i32) -> (i32, i32) {
    %c0_i32 = arith.constant 0 : i32
    return %arg0, %arg1 : i32, i32
  }
}

module attributes {stable_mosaic.version = 11 : i64} {
  func.func @_resize_matmul_kernel(%arg0: i32, %arg1: i32, %arg2: memref<16x4xf32, #tpu.memory_space<vmem>>, %arg3: memref<1x4x20xf32, #tpu.memory_space<vmem>>, %arg4: memref<1x16x20xf32, #tpu.memory_space<vmem>>) attributes {dimension_semantics = [#tpu.dimension_semantics<parallel>, #tpu.dimension_semantics<parallel>], iteration_bounds = array<i64: 2, 1>, scalar_prefetch = 0 : i64, scratch_operands = 0 : i64, tpu.core_type = #tpu.core_type<tc>, window_params = [{pipeline_mode = #tpu.pipeline_mode<synchronous>, transform_indices = @transform_0, window_bounds = array<i64: 16, 4>}, {transform_indices = @transform_1, window_bounds = array<i64: 1, 4, 20>}, {transform_indices = @transform_2, window_bounds = array<i64: 1, 16, 20>}]} {
    %c0 = arith.constant 0 : index
    %c0_0 = arith.constant 0 : index
    %0 = vector.load %arg2[%c0, %c0_0] : memref<16x4xf32, #tpu.memory_space<vmem>>, vector<16x4xf32>
    %c0_1 = arith.constant 0 : index
    %c0_2 = arith.constant 0 : index
    %c0_3 = arith.constant 0 : index
    %1 = vector.load %arg3[%c0_1, %c0_2, %c0_3] : memref<1x4x20xf32, #tpu.memory_space<vmem>>, vector<1x4x20xf32>
    %2 = vector.shape_cast %1 : vector<1x4x20xf32> to vector<4x20xf32>
    %cst = arith.constant dense<0.000000e+00> : vector<16x20xf32>
    %3 = tpu.matmul %0, %2, %cst {dimension_numbers = #tpu.dot_dimension_numbers<[1], [0], [0], [1], [0, 0, 1, 1], [], []>} : vector<16x4xf32>, vector<4x20xf32>, vector<16x20xf32> -> vector<16x20xf32>
    %c0_4 = arith.constant 0 : index
    %c0_5 = arith.constant 0 : index
    %c0_6 = arith.constant 0 : index
    %4 = vector.load %arg4[%c0_4, %c0_5, %c0_6] : memref<1x16x20xf32, #tpu.memory_space<vmem>>, vector<1x16x20xf32>
    %5 = vector.shape_cast %4 : vector<1x16x20xf32> to vector<16x20xf32>
    %6 = vector.shape_cast %3 : vector<16x20xf32> to vector<1x16x20xf32>
    tpu.vector_store %arg4[%c0_4, %c0_5, %c0_6], %6 {strides = array<i32>} : memref<1x16x20xf32, #tpu.memory_space<vmem>>, vector<1x16x20xf32>,
    return
  }
  func.func @transform_0(%arg0: i32, %arg1: i32) -> (i32, i32) {
    %c0_i32 = arith.constant 0 : i32
    %c0_i32_0 = arith.constant 0 : i32
    %c0_i32_1 = arith.constant 0 : i32
    return %c0_i32, %c0_i32_0 : i32, i32
  }
  func.func @transform_1(%arg0: i32, %arg1: i32) -> (i32, i32, i32) {
    %c0_i32 = arith.constant 0 : i32
    %c0_i32_0 = arith.constant 0 : i32
    return %arg0, %c0_i32, %arg1 : i32, i32, i32
  }
  func.func @transform_2(%arg0: i32, %arg1: i32) -> (i32, i32, i32) {
    %c0_i32 = arith.constant 0 : i32
    %c0_i32_0 = arith.constant 0 : i32
    return %arg0, %c0_i32, %arg1 : i32, i32, i32
  }
}

module attributes {stable_mosaic.version = 11 : i64} {
  func.func @_resize_matmul_kernel(%arg0: i32, %arg1: memref<16x4xf32, #tpu.memory_space<vmem>>, %arg2: memref<1x4x5xf32, #tpu.memory_space<vmem>>, %arg3: memref<1x16x5xf32, #tpu.memory_space<vmem>>) attributes {dimension_semantics = [#tpu.dimension_semantics<parallel>], iteration_bounds = array<i64: 32>, scalar_prefetch = 0 : i64, scratch_operands = 0 : i64, tpu.core_type = #tpu.core_type<tc>, window_params = [{pipeline_mode = #tpu.pipeline_mode<synchronous>, transform_indices = @transform_0, window_bounds = array<i64: 16, 4>}, {transform_indices = @transform_1, window_bounds = array<i64: 1, 4, 5>}, {transform_indices = @transform_2, window_bounds = array<i64: 1, 16, 5>}]} {
    %c0 = arith.constant 0 : index
    %c0_0 = arith.constant 0 : index
    %0 = vector.load %arg1[%c0, %c0_0] : memref<16x4xf32, #tpu.memory_space<vmem>>, vector<16x4xf32>
    %c0_1 = arith.constant 0 : index
    %c0_2 = arith.constant 0 : index
    %c0_3 = arith.constant 0 : index
    %1 = vector.load %arg2[%c0_1, %c0_2, %c0_3] : memref<1x4x5xf32, #tpu.memory_space<vmem>>, vector<1x4x5xf32>
    %2 = vector.shape_cast %1 : vector<1x4x5xf32> to vector<4x5xf32>
    %cst = arith.constant dense<0.000000e+00> : vector<16x5xf32>
    %3 = tpu.matmul %0, %2, %cst {dimension_numbers = #tpu.dot_dimension_numbers<[1], [0], [0], [1], [0, 0, 1, 1], [], []>} : vector<16x4xf32>, vector<4x5xf32>, vector<16x5xf32> -> vector<16x5xf32>
    %c0_4 = arith.constant 0 : index
    %c0_5 = arith.constant 0 : index
    %c0_6 = arith.constant 0 : index
    %4 = vector.load %arg3[%c0_4, %c0_5, %c0_6] : memref<1x16x5xf32, #tpu.memory_space<vmem>>, vector<1x16x5xf32>
    %5 = vector.shape_cast %4 : vector<1x16x5xf32> to vector<16x5xf32>
    %6 = vector.shape_cast %3 : vector<16x5xf32> to vector<1x16x5xf32>
    tpu.vector_store %arg3[%c0_4, %c0_5, %c0_6], %6 {strides = array<i32>} : memref<1x16x5xf32, #tpu.memory_space<vmem>>, vector<1x16x5xf32>,
    return
  }
  func.func @transform_0(%arg0: i32) -> (i32, i32) {
    %c0_i32 = arith.constant 0 : i32
    %c0_i32_0 = arith.constant 0 : i32
    %c0_i32_1 = arith.constant 0 : i32
    return %c0_i32, %c0_i32_0 : i32, i32
  }
  func.func @transform_1(%arg0: i32) -> (i32, i32, i32) {
    %c0_i32 = arith.constant 0 : i32
    %c0_i32_0 = arith.constant 0 : i32
    %c0_i32_1 = arith.constant 0 : i32
    return %arg0, %c0_i32, %c0_i32_0 : i32, i32, i32
  }
  func.func @transform_2(%arg0: i32) -> (i32, i32, i32) {
    %c0_i32 = arith.constant 0 : i32
    %c0_i32_0 = arith.constant 0 : i32
    %c0_i32_1 = arith.constant 0 : i32
    return %arg0, %c0_i32, %c0_i32_0 : i32, i32, i32
  }
}

</mosaic_0001>

<bundles_post_ra>
// kernel: resnet_base_oc_forward.22
= control target key start
LH: loop header
LB: loop body
LE: loop exit
PB: predicated region body
PF: predicated region fallthrough
CT: control target
= control target key end

     0   :  { %vm118_vm0 = vcmask 60416   ;;  %s330_s0 = inlined_call_operand.vmem [shape: bf16[128,8], index: 0, kind: input, shape index: {}]   ;;  %s331_s1 = inlined_call_operand.vmem [shape: f32[1,8], index: 1, kind: input, shape index: {}]   ;;  %s332_s2 = inlined_call_operand.vmem [shape: f32[1,8], index: 2, kind: input, shape index: {}]   ;;  %s333_s3 = inlined_call_operand.vmem [shape: bf16[128,8], index: 3, kind: output, shape index: {}]  }
   0x1   :  { %v140_v0 = vld [vmem:[%s330_s0] sm:$0xff]   ;;  %v171_v5 = vld [vmem:[%s330_s0 + $0x8] sm:$0xff]   ;;  %v172_v8 = vld [vmem:[%s330_s0 + $0x10] sm:$0xff]  }
   0x2   :  { %v206_v1 = vld [vmem:[%s331_s1] ss:$0 sm:$0xff]  ;;  %v141_v2 = vunpack.c.l.bf16 %v140_v0  ;;  %v142_v4 = vunpack.c.h.bf16 %v140_v0  ;;  %v145_v6 = vunpack.c.l.bf16 %v171_v5  ;;  %v146_v7 = vunpack.c.h.bf16 %v171_v5  ;;  %v173_v9 = vld [vmem:[%s330_s0 + $0x18] sm:$0xff]   ;;  %v175_v39 = vld [vmem:[%s330_s0 + $0x28] sm:$0xff]  }
   0x3   :  { %v211_v3 = vld [vmem:[%s332_s2] ss:$0 sm:$0xff]  ;;  %v149_v12 = vunpack.c.l.bf16 %v172_v8  ;;  %v150_v13 = vunpack.c.h.bf16 %v172_v8  ;;  %v153_v16 = vunpack.c.l.bf16 %v173_v9  ;;  %v154_v17 = vunpack.c.h.bf16 %v173_v9  ;;  %v176_v44 = vld [vmem:[%s330_s0 + $0x30] sm:$0xff]   ;;  %v177_v49 = vld [vmem:[%s330_s0 + $0x38] sm:$0xff]  }
   0x4   :  { %v50_v10 = vmul.f32 %v206_v1, %v141_v2  ;;  %v51_v11 = vmul.f32 %v206_v1, %v142_v4  ;;  %v52_v14 = vmul.f32 %v206_v1, %v145_v6  ;;  %v53_v15 = vmul.f32 %v206_v1, %v146_v7  ;;  %v174_v34 = vld [vmem:[%s330_s0 + $0x20] sm:$0xff]  }
   0x5   :  { %v54_v20 = vmul.f32 %v206_v1, %v149_v12  ;;  %v55_v21 = vmul.f32 %v206_v1, %v150_v13  ;;  %v56_v24 = vmul.f32 %v206_v1, %v153_v16  ;;  %v57_v25 = vmul.f32 %v206_v1, %v154_v17 }
   0x6   :  { %v70_v18 = vadd.f32 %v211_v3, %v50_v10  ;;  %v71_v19 = vadd.f32 %v211_v3, %v51_v11  ;;  %v72_v22 = vadd.f32 %v211_v3, %v52_v14  ;;  %v73_v23 = vadd.f32 %v211_v3, %v53_v15 }
   0x7   :  { %v74_v28 = vadd.f32 %v211_v3, %v54_v20  ;;  %v75_v29 = vadd.f32 %v211_v3, %v55_v21  ;;  %v76_v32 = vadd.f32 %v211_v3, %v56_v24  ;;  %v77_v33 = vadd.f32 %v211_v3, %v57_v25 }
   0x8   :  { %v86_v26 = vmax.f32 %v70_v18, 0.0  ;;  %v87_v27 = vmax.f32 %v71_v19, 0.0  ;;  %v88_v30 = vmax.f32 %v72_v22, 0.0  ;;  %v89_v31 = vmax.f32 %v73_v23, 0.0 }
   0x9   :  { %v90_v37 = vmax.f32 %v74_v28, 0.0  ;;  %v91_v38 = vmax.f32 %v75_v29, 0.0  ;;  %v92_v42 = vmax.f32 %v76_v32, 0.0  ;;  %v93_v43 = vmax.f32 %v77_v33, 0.0 }
   0xa   :  { %v102_v35 = vpack.c.bf16 %v86_v26, %v86_v26  ;;  %v103_v36 = vpack.c.bf16 %v87_v27, %v87_v27  ;;  %v104_v40 = vpack.c.bf16 %v88_v30, %v88_v30  ;;  %v105_v41 = vpack.c.bf16 %v89_v31, %v89_v31 }
   0xb   :  { %v106_v45 = vpack.c.bf16 %v90_v37, %v90_v37  ;;  %v107_v46 = vpack.c.bf16 %v91_v38, %v91_v38  ;;  %v157_v47 = vunpack.c.l.bf16 %v174_v34  ;;  %v158_v48 = vunpack.c.h.bf16 %v174_v34 }
   0xc   :  { %119 = vst.msk [vmem:[%s333_s3] sm:$0xf] %vm118_vm0, %v102_v35  ;;  %v108_v50 = vpack.c.bf16 %v92_v42, %v92_v42  ;;  %v109_v51 = vpack.c.bf16 %v93_v43, %v93_v43  ;;  %v161_v52 = vunpack.c.l.bf16 %v175_v39  ;;  %v162_v53 = vunpack.c.h.bf16 %v175_v39 }
   0xd   :  { %120 = vst.msk [vmem:[%s333_s3 + $0x4] sm:$0xf] %vm118_vm0, %v103_v36  ;;  %v58_v54 = vmul.f32 %v206_v1, %v157_v47  ;;  %v59_v55 = vmul.f32 %v206_v1, %v158_v48  ;;  %v165_v56 = vunpack.c.l.bf16 %v176_v44  ;;  %v166_v57 = vunpack.c.h.bf16 %v176_v44 }
   0xe   :  { %121 = vst.msk [vmem:[%s333_s3 + $0x8] sm:$0xf] %vm118_vm0, %v104_v40  ;;  %v60_v58 = vmul.f32 %v206_v1, %v161_v52  ;;  %v61_v59 = vmul.f32 %v206_v1, %v162_v53  ;;  %v169_v60 = vunpack.c.l.bf16 %v177_v49  ;;  %v170_v61 = vunpack.c.h.bf16 %v177_v49 }
   0xf   :  { %122 = vst.msk [vmem:[%s333_s3 + $0xc] sm:$0xf] %vm118_vm0, %v105_v41  ;;  %v78_v62 = vadd.f32 %v211_v3, %v58_v54  ;;  %v79_v63 = vadd.f32 %v211_v3, %v59_v55  ;;  %v62_v0 = vmul.f32 %v206_v1, %v165_v56  ;;  %v63_v2 = vmul.f32 %v206_v1, %v166_v57 }
  0x10   :  { %123 = vst.msk [vmem:[%s333_s3 + $0x10] sm:$0xf] %vm118_vm0, %v106_v45  ;;  %v80_v4 = vadd.f32 %v211_v3, %v60_v58  ;;  %v81_v5 = vadd.f32 %v211_v3, %v61_v59  ;;  %v64_v6 = vmul.f32 %v206_v1, %v169_v60  ;;  %v65_v7 = vmul.f32 %v206_v1, %v170_v61 }
  0x11   :  { %124 = vst.msk [vmem:[%s333_s3 + $0x14] sm:$0xf] %vm118_vm0, %v107_v46  ;;  %v94_v8 = vmax.f32 %v78_v62, 0.0  ;;  %v95_v9 = vmax.f32 %v79_v63, 0.0  ;;  %v82_v10 = vadd.f32 %v211_v3, %v62_v0  ;;  %v83_v11 = vadd.f32 %v211_v3, %v63_v2 }
  0x12   :  { %125 = vst.msk [vmem:[%s333_s3 + $0x18] sm:$0xf] %vm118_vm0, %v108_v50  ;;  %v96_v12 = vmax.f32 %v80_v4, 0.0  ;;  %v97_v13 = vmax.f32 %v81_v5, 0.0  ;;  %v84_v1 = vadd.f32 %v211_v3, %v64_v6  ;;  %v85_v14 = vadd.f32 %v211_v3, %v65_v7 }
  0x13   :  { %126 = vst.msk [vmem:[%s333_s3 + $0x1c] sm:$0xf] %vm118_vm0, %v109_v51  ;;  %v110_v15 = vpack.c.bf16 %v94_v8, %v94_v8  ;;  %v111_v16 = vpack.c.bf16 %v95_v9, %v95_v9  ;;  %v98_v17 = vmax.f32 %v82_v10, 0.0  ;;  %v99_v18 = vmax.f32 %v83_v11, 0.0 }
  0x14   :  { %v112_v19 = vpack.c.bf16 %v96_v12, %v96_v12  ;;  %v113_v20 = vpack.c.bf16 %v97_v13, %v97_v13  ;;  %v100_v21 = vmax.f32 %v84_v1, 0.0  ;;  %v101_v22 = vmax.f32 %v85_v14, 0.0 }
  0x15   :  { %127 = vst.msk [vmem:[%s333_s3 + $0x20] sm:$0xf] %vm118_vm0, %v110_v15  ;;  %v114_v23 = vpack.c.bf16 %v98_v17, %v98_v17  ;;  %v115_v3 = vpack.c.bf16 %v99_v18, %v99_v18 }
  0x16   :  { %128 = vst.msk [vmem:[%s333_s3 + $0x24] sm:$0xf] %vm118_vm0, %v111_v16  ;;  %v116_v24 = vpack.c.bf16 %v100_v21, %v100_v21  ;;  %v117_v25 = vpack.c.bf16 %v101_v22, %v101_v22 }
  0x17   :  { %129 = vst.msk [vmem:[%s333_s3 + $0x28] sm:$0xf] %vm118_vm0, %v112_v19 }
  0x18   :  { %130 = vst.msk [vmem:[%s333_s3 + $0x2c] sm:$0xf] %vm118_vm0, %v113_v20 }
  0x19   :  { %131 = vst.msk [vmem:[%s333_s3 + $0x30] sm:$0xf] %vm118_vm0, %v114_v23 }
  0x1a   :  { %132 = vst.msk [vmem:[%s333_s3 + $0x34] sm:$0xf] %vm118_vm0, %v115_v3 }
  0x1b   :  { %133 = vst.msk [vmem:[%s333_s3 + $0x38] sm:$0xf] %vm118_vm0, %v116_v24 }
  0x1c   :  { %134 = vst.msk [vmem:[%s333_s3 + $0x3c] sm:$0xf] %vm118_vm0, %v117_v25 }

// kernel: resnet_base_oc_forward.21
= control target key start
LH: loop header
LB: loop body
LE: loop exit
PB: predicated region body
PF: predicated region fallthrough
CT: control target
= control target key end

     0   :  { %vm42_vm0 = vcmask 64512   ;;  %vm80_vm1 = vcmask 57344   ;;  %s260_s0 = inlined_call_operand.vmem [shape: bf16[128,8], index: 0, kind: input, shape index: {}]   ;;  %s261_s1 = inlined_call_operand.vmem [shape: f32[1,8], index: 1, kind: output, shape index: {0}]   ;;  %s262_s2 = inlined_call_operand.vmem [shape: f32[1,8], index: 2, kind: output, shape index: {1}]  }
   0x1   :  { %v145_v0 = vld [vmem:[%s260_s0] sm:$0xff]   ;;  %v176_v1 = vld [vmem:[%s260_s0 + $0x8] sm:$0xff]   ;;  %v177_v5 = vld [vmem:[%s260_s0 + $0x10] sm:$0xff]  }
   0x2   :  { %v146_v2 = vunpack.c.l.bf16 %v145_v0  ;;  %v147_v3 = vunpack.c.h.bf16 %v145_v0  ;;  %v150_v4 = vunpack.c.l.bf16 %v176_v1  ;;  %v151_v6 = vunpack.c.h.bf16 %v176_v1  ;;  %v178_v13 = vld [vmem:[%s260_s0 + $0x18] sm:$0xff]   ;;  %v179_v23 = vld [vmem:[%s260_s0 + $0x20] sm:$0xff]   ;;  %v180_v36 = vld [vmem:[%s260_s0 + $0x28] sm:$0xff]  }
   0x3   :  { %v154_v11 = vunpack.c.l.bf16 %v177_v5  ;;  %v155_v15 = vunpack.c.h.bf16 %v177_v5  ;;  %v158_v20 = vunpack.c.l.bf16 %v178_v13  ;;  %v159_v26 = vunpack.c.h.bf16 %v178_v13  ;;  %v181_v49 = vld [vmem:[%s260_s0 + $0x30] sm:$0xff]   ;;  %v182_v62 = vld [vmem:[%s260_s0 + $0x38] sm:$0xff]  }
   0x4   :  { %v43_v7 = vsel %vm42_vm0, %v146_v2, 0.0  ;;  %v44_v8 = vsel %vm42_vm0, %v147_v3, 0.0  ;;  %v46_v9 = vsel %vm42_vm0, %v150_v4, 0.0  ;;  %v48_v12 = vsel %vm42_vm0, %v151_v6, 0.0 }
   0x5   :  { %v45_v10 = vadd.f32 %v44_v8, %v43_v7  ;;  %v50_v16 = vsel %vm42_vm0, %v154_v11, 0.0  ;;  %v82_v18 = vmul.f32 %v146_v2, %v146_v2  ;;  %v83_v19 = vmul.f32 %v147_v3, %v147_v3 }
   0x6   :  { %v52_v21 = vsel %vm42_vm0, %v155_v15, 0.0  ;;  %v84_v22 = vmul.f32 %v150_v4, %v150_v4  ;;  %v85_v25 = vmul.f32 %v151_v6, %v151_v6  ;;  %v54_v27 = vsel %vm42_vm0, %v158_v20, 0.0 }
   0x7   :  { %v47_v14 = vadd.f32 %v46_v9, %v45_v10  ;;  %v86_v29 = vmul.f32 %v154_v11, %v154_v11  ;;  %v98_v30 = vsel %vm42_vm0, %v82_v18, 0.0  ;;  %v99_v31 = vsel %vm42_vm0, %v83_v19, 0.0 }
   0x8   :  { %v162_v32 = vunpack.c.l.bf16 %v179_v23  ;;  %v56_v33 = vsel %vm42_vm0, %v159_v26, 0.0  ;;  %v100_v34 = vadd.f32 %v99_v31, %v98_v30  ;;  %v101_v35 = vsel %vm42_vm0, %v84_v22, 0.0 }
   0x9   :  { %v49_v17 = vadd.f32 %v48_v12, %v47_v14  ;;  %v87_v38 = vmul.f32 %v155_v15, %v155_v15  ;;  %v103_v39 = vsel %vm42_vm0, %v85_v25, 0.0  ;;  %v163_v40 = vunpack.c.h.bf16 %v179_v23 }
   0xa   :  { %v58_v41 = vsel %vm42_vm0, %v162_v32, 0.0  ;;  %v102_v42 = vadd.f32 %v101_v35, %v100_v34  ;;  %v88_v44 = vmul.f32 %v158_v20, %v158_v20  ;;  %v105_v45 = vsel %vm42_vm0, %v86_v29, 0.0 }
   0xb   :  { %v51_v24 = vadd.f32 %v50_v16, %v49_v17  ;;  %v166_v46 = vunpack.c.l.bf16 %v180_v36  ;;  %v60_v47 = vsel %vm42_vm0, %v163_v40, 0.0  ;;  %v89_v51 = vmul.f32 %v159_v26, %v159_v26 }
   0xc   :  { %v104_v48 = vadd.f32 %v103_v39, %v102_v42  ;;  %v107_v52 = vsel %vm42_vm0, %v87_v38, 0.0  ;;  %v167_v53 = vunpack.c.h.bf16 %v180_v36  ;;  %v90_v57 = vmul.f32 %v162_v32, %v162_v32 }
   0xd   :  { %v53_v28 = vadd.f32 %v52_v21, %v51_v24  ;;  %v62_v54 = vsel %vm42_vm0, %v166_v46, 0.0  ;;  %v109_v58 = vsel %vm42_vm0, %v88_v44, 0.0  ;;  %v170_v59 = vunpack.c.l.bf16 %v181_v49 }
   0xe   :  { %v106_v55 = vadd.f32 %v105_v45, %v104_v48  ;;  %v64_v60 = vsel %vm42_vm0, %v167_v53, 0.0  ;;  %v91_v0 = vmul.f32 %v163_v40, %v163_v40  ;;  %v111_v1 = vsel %vm42_vm0, %v89_v51, 0.0 }
   0xf   :  { %v55_v37 = vadd.f32 %v54_v27, %v53_v28  ;;  %v171_v2 = vunpack.c.h.bf16 %v181_v49  ;;  %v66_v3 = vsel %vm42_vm0, %v170_v59, 0.0  ;;  %v92_v6 = vmul.f32 %v166_v46, %v166_v46 }
  0x10   :  { %v108_v61 = vadd.f32 %v107_v52, %v106_v55  ;;  %v113_v7 = vsel %vm42_vm0, %v90_v57, 0.0  ;;  %v174_v8 = vunpack.c.l.bf16 %v182_v62  ;;  %v93_v12 = vmul.f32 %v167_v53, %v167_v53 }
  0x11   :  { %v57_v43 = vadd.f32 %v56_v33, %v55_v37  ;;  %v68_v9 = vsel %vm42_vm0, %v171_v2, 0.0  ;;  %v115_v13 = vsel %vm42_vm0, %v91_v0, 0.0  ;;  %v175_v14 = vunpack.c.h.bf16 %v182_v62 }
  0x12   :  { %v110_v4 = vadd.f32 %v109_v58, %v108_v61  ;;  %v70_v15 = vsel %vm42_vm0, %v174_v8, 0.0  ;;  %v94_v18 = vmul.f32 %v170_v59, %v170_v59  ;;  %v117_v19 = vsel %vm42_vm0, %v92_v6, 0.0 }
  0x13   :  { %v59_v50 = vadd.f32 %v58_v41, %v57_v43  ;;  %v72_v20 = vsel %vm42_vm0, %v175_v14, 0.0  ;;  %v95_v23 = vmul.f32 %v171_v2, %v171_v2  ;;  %v119_v24 = vsel %vm42_vm0, %v93_v12, 0.0 }
  0x14   :  { %v112_v10 = vadd.f32 %v111_v1, %v110_v4  ;;  %v96_v27 = vmul.f32 %v174_v8, %v174_v8  ;;  %v121_v28 = vsel %vm42_vm0, %v94_v18, 0.0  ;;  %v97_v31 = vmul.f32 %v175_v14, %v175_v14 }
  0x15   :  { %v61_v56 = vadd.f32 %v60_v47, %v59_v50  ;;  %v123_v32 = vsel %vm42_vm0, %v95_v23, 0.0 }
  0x16   :  { %v114_v16 = vadd.f32 %v113_v7, %v112_v10  ;;  %v125_v35 = vsel %vm42_vm0, %v96_v27, 0.0  ;;  %v127_v38 = vsel %vm42_vm0, %v97_v31, 0.0 }
  0x17   :  { %v63_v63 = vadd.f32 %v62_v54, %v61_v56 }
  0x18   :  { %v116_v21 = vadd.f32 %v115_v13, %v114_v16 }
  0x19   :  { %v65_v5 = vadd.f32 %v64_v60, %v63_v63 }
  0x1a   :  { %v118_v25 = vadd.f32 %v117_v19, %v116_v21 }
  0x1b   :  { %v67_v11 = vadd.f32 %v66_v3, %v65_v5 }
  0x1c   :  { %v120_v29 = vadd.f32 %v119_v24, %v118_v25 }
  0x1d   :  { %v69_v17 = vadd.f32 %v68_v9, %v67_v11 }
  0x1e   :  { %v122_v33 = vadd.f32 %v121_v28, %v120_v29 }
  0x1f   :  { %v71_v22 = vadd.f32 %v70_v15, %v69_v17 }
  0x20   :  { %v124_v36 = vadd.f32 %v123_v32, %v122_v33 }
  0x21   :  { %v73_v26 = vadd.f32 %v72_v20, %v71_v22 }
  0x22   :  { %v126_v39 = vadd.f32 %v125_v35, %v124_v36 }
  0x23   :  { %v74_v30 = vrot.slane %v73_v26, 4 }
  0x24   :  { %v128_v41 = vadd.f32 %v127_v38, %v126_v39 }
  0x25   :  { %v75_v34 = vadd.f32 %v74_v30, %v73_v26 }
  0x26   :  { %v129_v43 = vrot.slane %v128_v41, 4 }
  0x27   :  { %v76_v37 = vrot.slane %v75_v34, 2 }
  0x28   :  { %v130_v45 = vadd.f32 %v129_v43, %v128_v41 }
  0x29   :  { %v77_v40 = vadd.f32 %v76_v37, %v75_v34 }
  0x2a   :  { %v131_v46 = vrot.slane %v130_v45, 2 }
  0x2b   :  { %v78_v42 = vrot.slane %v77_v40, 1 }
  0x2c   :  { %v132_v47 = vadd.f32 %v131_v46, %v130_v45 }
  0x2d   :  { %v79_v44 = vadd.f32 %v78_v42, %v77_v40 }
  0x2e   :  { %v133_v48 = vrot.slane %v132_v47, 1 }
  0x2f   :  { %81 = vst.msk [vmem:[%s261_s1] sm:$0x1] %vm80_vm1, %v79_v44 }
  0x30   :  { %v134_v49 = vadd.f32 %v133_v48, %v132_v47 }
  0x32   :  { %135 = vst.msk [vmem:[%s262_s2] sm:$0x1] %vm80_vm1, %v134_v49 }

// kernel: resnet_base_oc_forward.20
= control target key start
LH: loop header
LB: loop body
LE: loop exit
PB: predicated region body
PF: predicated region fallthrough
CT: control target
= control target key end

     0   :  { %vm147_vm0 = vcmask 1044480   ;;  %vm148_vm1 = vcmask 1045504   ;;  %v423_v2 = vmov 65535   ;;  %vm122_vm2 = vcmask 220160   ;;  %s512_s1 = inlined_call_operand.vmem [shape: bf16[27,128], index: 1, kind: input, shape index: {}]   ;;  %s513_s2 = inlined_call_operand.vmem [shape: f32[1,128], index: 2, kind: input, shape index: {}]   ;;  %s514_s0 = inlined_call_operand.vmem [shape: bf16[128,27], index: 0, kind: input, shape index: {}]   ;;  %s515_s3 = inlined_call_operand.vmem [shape: bf16[128,128], index: 3, kind: output, shape index: {}]  }
   0x1   :  { %v348_v0 = vld [vmem:[%s512_s1 + $0x8] sm:$0xf]  ;;  %v367_v1 = vld [vmem:[%s512_s1 + $0x8] sm:$0x30]  ;;  %v149_v3 = vsel %vm147_vm0, 4294967295, %v423_v2  ;;  %v366_v7 = vld [vmem:[%s512_s1] sm:$0xff] }
   0x2   :  { %v349_v4 = vor.u32 %v367_v1, %v348_v0  ;;  %v150_v5 = vsel %vm148_vm1, %v149_v3, 0  ;;  %v358_v8 = vld [vmem:[%s514_s0] sm:$0xff]  ;;  %v360_v9 = vld [vmem:[%s514_s0 + $0x10] sm:$0xff]  ;;  %v359_v12 = vld [vmem:[%s514_s0 + $0x8] sm:$0xff] }
   0x3   :  { %v362_v10 = vld [vmem:[%s514_s0 + $0x20] sm:$0xff]  ;;  %v364_v11 = vld [vmem:[%s514_s0 + $0x30] sm:$0xff]  ;;  %v361_v13 = vld [vmem:[%s514_s0 + $0x18] sm:$0xff] }
   0x4   :  { %v152_v6 = vand.u32 %v349_v4, %v150_v5  ;;  %v363_v14 = vld [vmem:[%s514_s0 + $0x28] sm:$0xff]  ;;  %v365_v15 = vld [vmem:[%s514_s0 + $0x38] sm:$0xff]  ;;  %v422_v18 = vld [vmem:[%s513_s2] ss:$0 sm:$0xff] }
   0x6   :  { %160 = vmatpush.bf16.msra.mxu0 %v152_v6  ;;  %415 = vmatpush.bf16.msra.mxu1 %v152_v6 }
   0x7   :  { %416 = vmatpush.bf16.msra.mxu2 %v152_v6  ;;  %417 = vmatpush.bf16.msra.mxu3 %v152_v6 }
   0xa   :  { %161 = vmatpush.bf16.msra.mxu0 %v366_v7  ;;  %418 = vmatpush.bf16.msra.mxu1 %v366_v7 }
   0xb   :  { %419 = vmatpush.bf16.msra.mxu2 %v366_v7  ;;  %420 = vmatpush.bf16.msra.mxu3 %v366_v7 }
   0xd   :  { %350 = vmatmul.msk.bf16.vlgmr.msra.gmra.mxu0 %vm122_vm2, %v358_v8  ;;  %352 = vmatmul.msk.bf16.vlgmr.msra.gmra.mxu1 %vm122_vm2, %v360_v9 }
   0xe   :  { %354 = vmatmul.msk.bf16.vlgmr.msra.gmra.mxu2 %vm122_vm2, %v362_v10  ;;  %356 = vmatmul.msk.bf16.vlgmr.msra.gmra.mxu3 %vm122_vm2, %v364_v11 }
  0x1d   :  { %351 = vmatmul.msk.bf16.gmra.mxu0 %vm122_vm2, %v359_v12  ;;  %353 = vmatmul.msk.bf16.gmra.mxu1 %vm122_vm2, %v361_v13 }
  0x1e   :  { %355 = vmatmul.msk.bf16.gmra.mxu2 %vm122_vm2, %v363_v14  ;;  %357 = vmatmul.msk.bf16.gmra.mxu3 %vm122_vm2, %v365_v15 }
  0x8a   :  { %v163_v16 = vpop.f32.mrf.mxu0  ;;  %v173_v17 = vpop.f32.mrf.mxu1 }
  0x8b   :  { %v258_v23 = vadd.f32 %v422_v18, %v163_v16  ;;  %v262_v24 = vadd.f32 %v422_v18, %v173_v17 }
  0x91   :  { %v183_v19 = vpop.f32.mrf.mxu2  ;;  %v193_v20 = vpop.f32.mrf.mxu3 }
  0x92   :  { %v165_v21 = vpop.f32.mrf.mxu0  ;;  %v175_v22 = vpop.f32.mrf.mxu1  ;;  %v266_v31 = vadd.f32 %v422_v18, %v183_v19  ;;  %v270_v32 = vadd.f32 %v422_v18, %v193_v20 }
  0x93   :  { %v259_v25 = vadd.f32 %v422_v18, %v165_v21  ;;  %v263_v26 = vadd.f32 %v422_v18, %v175_v22 }
  0x95   :  { %v371_v27 = vpack.c.bf16 %v259_v25, %v258_v23  ;;  %v381_v28 = vpack.c.bf16 %v263_v26, %v262_v24 }
  0x97   :  { %372 = vst [vmem:[%s515_s3] sm:$0xff] %v371_v27  }
  0x98   :  { %409 = vst [vmem:[%s515_s3 + $0x10] sm:$0xff] %v381_v28  }
  0x99   :  { %v185_v29 = vpop.f32.mrf.mxu2  ;;  %v195_v30 = vpop.f32.mrf.mxu3 }
  0x9a   :  { %v267_v33 = vadd.f32 %v422_v18, %v185_v29  ;;  %v271_v34 = vadd.f32 %v422_v18, %v195_v30  ;;  %v168_v35 = vpop.f32.mrf.mxu0  ;;  %v178_v36 = vpop.f32.mrf.mxu1 }
  0x9b   :  { %v260_v43 = vadd.f32 %v422_v18, %v168_v35  ;;  %v264_v44 = vadd.f32 %v422_v18, %v178_v36 }
  0x9c   :  { %v391_v37 = vpack.c.bf16 %v267_v33, %v266_v31  ;;  %v401_v38 = vpack.c.bf16 %v271_v34, %v270_v32 }
  0x9e   :  { %411 = vst [vmem:[%s515_s3 + $0x20] sm:$0xff] %v391_v37  }
  0x9f   :  { %413 = vst [vmem:[%s515_s3 + $0x30] sm:$0xff] %v401_v38  }
  0xa1   :  { %v188_v39 = vpop.f32.mrf.mxu2  ;;  %v198_v40 = vpop.f32.mrf.mxu3 }
  0xa2   :  { %v170_v41 = vpop.f32.mrf.mxu0  ;;  %v180_v42 = vpop.f32.mrf.mxu1  ;;  %v268_v51 = vadd.f32 %v422_v18, %v188_v39  ;;  %v272_v52 = vadd.f32 %v422_v18, %v198_v40 }
  0xa3   :  { %v261_v45 = vadd.f32 %v422_v18, %v170_v41  ;;  %v265_v46 = vadd.f32 %v422_v18, %v180_v42 }
  0xa5   :  { %v376_v47 = vpack.c.bf16 %v261_v45, %v260_v43  ;;  %v386_v48 = vpack.c.bf16 %v265_v46, %v264_v44 }
  0xa7   :  { %408 = vst [vmem:[%s515_s3 + $0x8] sm:$0xff] %v376_v47  }
  0xa8   :  { %410 = vst [vmem:[%s515_s3 + $0x18] sm:$0xff] %v386_v48  }
  0xa9   :  { %v190_v49 = vpop.f32.mrf.mxu2  ;;  %v200_v50 = vpop.f32.mrf.mxu3 }
  0xaa   :  { %v269_v53 = vadd.f32 %v422_v18, %v190_v49  ;;  %v273_v54 = vadd.f32 %v422_v18, %v200_v50 }
  0xac   :  { %v396_v55 = vpack.c.bf16 %v269_v53, %v268_v51  ;;  %v406_v56 = vpack.c.bf16 %v273_v54, %v272_v52 }
  0xae   :  { %412 = vst [vmem:[%s515_s3 + $0x28] sm:$0xff] %v396_v55  }
  0xaf   :  { %414 = vst [vmem:[%s515_s3 + $0x38] sm:$0xff] %v406_v56  }

// kernel: resnet_base_oc_forward.23
= control target key start
LH: loop header
LB: loop body
LE: loop exit
PB: predicated region body
PF: predicated region fallthrough
CT: control target
= control target key end

     0   :  { %s347_s9 = smov 0   ;;  %s349_s10 = smov 0   ;;  %s376_s0 = inlined_call_operand.vmem [shape: f32[4,8], index: 0, kind: input, shape index: {}]   ;;  %s377_s1 = inlined_call_operand.vmem [shape: bf16[2,8,64], index: 1, kind: input, shape index: {}]   ;;  %s378_s2 = inlined_call_operand.vmem [shape: bf16[2,4,64], index: 2, kind: output, shape index: {}]  }
   0x1   :  { %s351_s11 = smov 0  }
   0x2 LB: > { %s24_s12 = sadd.s32 1, %s326_s10  ;;  %p278_p0 = scmp.ge.s32.totalorder %s330_s11, 1  ;;  %s330_s11 = sphi %s351_s11, %s12_s11   ;;  %s326_s10 = sphi %s349_s10, %s380_s10   ;;  %s322_s9 = sphi %s347_s9, %s379_s9  }
   0x3   : > { %p26_p1 = scmp.ge.s32.totalorder %s24_s12, 2  ;;  %p130_p2 = scmp.lt.s32.totalorder %s330_s11, 3 }
   0x5   : > { %s382_s12 = smov (%p26_p1, %s24_s12), 0  ;;  %p131_p3 = pnand %p278_p0, %p130_p2 }
   0x6   : > { %p156_p4 = scmp.lt.s32.totalorder (!%p131_p3), %s322_s9, 1 }
   0x7   : > { %134 = sbr.rel (%p131_p3) target bundleno = 148 (0x94), region = 28 }
   0xc   : > { %s384_s9 = smov (!%p156_p4, %s322_s9), 1  ;;  %v170_v2 = vld [vmem:[%s376_s0] sm:$0xf]  ;;  %vm173_vm0 = vcmask 64512   ;;  %vm198_vm1 = vcmask 517120  }
   0xd   : > { %s279_s13 = sshll.u32 %s384_s9, 2  ;;  %s280_s19 = sshll.u32 %s384_s9, 1 }
   0xe   : > { %s162_s16 = scalar_lea.vmem %s377_s1, %s279_s13  ;;  %s169_s22 = scalar_lea.vmem %s378_s2, %s280_s19 }
   0xf   : > { %v171_v0 = vld [vmem:[%s162_s16] sm:$0xf] }
  0x10   : > { %v172_v1 = vunpack.c.l.bf16 %v171_v0 }
  0x12   : > { %192 = vmatpush.msra.mxu0 %v172_v1 }
  0x13   : > { %281 = vmatmul.msk.f32.vlgmr.msra.gmra.mxu0 %vm173_vm0, %v170_v2 }
  0x90   : > { %v194_v3 = vpop.f32.mrf.mxu0 }
  0x91   : > { %v197_v4 = vpack.c.bf16 %v194_v3, %v194_v3 }
  0x93   : > { %199 = vst.msk [vmem:[%s169_s22] sm:$0x3] %vm198_vm1, %v197_v4 }
  0x94 PF: > { %s12_s11 = sadd.s32 1, %s330_s11   ;;  %s379_s9 = smov %s326_s10 }
  0x95   : > { %p9_p5 = scmp.ge.s32.totalorder %s12_s11, 4   ;;  %s380_s10 = smov %s382_s12 }
  0x97   :  { %11 = sbr.rel (!%p9_p5) target bundleno = 2 (0x2), region = 58 }

// kernel: resnet_base_oc_forward.24
= control target key start
LH: loop header
LB: loop body
LE: loop exit
PB: predicated region body
PF: predicated region fallthrough
CT: control target
= control target key end

     0   :  { %s244_s9 = smov 0   ;;  %s272_s0 = inlined_call_operand.vmem [shape: f32[4,8], index: 0, kind: input, shape index: {}]   ;;  %s273_s1 = inlined_call_operand.vmem [shape: bf16[8,8,8], index: 1, kind: input, shape index: {}]   ;;  %s274_s2 = inlined_call_operand.vmem [shape: bf16[8,4,8], index: 2, kind: output, shape index: {}]  }
   0x1 LB: > { %s222_s10 = sadd.s32 4294967295, %s246_s9   ;;  %p226_p0 = scmp.ge.s32.totalorder %s246_s9, 1  ;;  %s246_s9 = sphi %s244_s9, %s12_s9  }
   0x2   : > { %p111_p1 = scmp.lt.s32.totalorder %s246_s9, 9 }
   0x4   : > { %p112_p2 = pnand %p226_p0, %p111_p1 }
   0x5   : > { %p131_p3 = scmp.lt.s32.totalorder (!%p112_p2), %s222_s10, 7 }
   0x6   : > { %115 = sbr.rel (%p112_p2) target bundleno = 147 (0x93), region = 28 }
   0xb   : > { %s276_s10 = smov (!%p131_p3, %s222_s10), 7  ;;  %v139_v2 = vld [vmem:[%s272_s0] sm:$0xf]  ;;  %vm142_vm0 = vcmask 64512   ;;  %vm167_vm1 = vcmask 58368  }
   0xc   : > { %s227_s11 = sshll.u32 %s276_s10, 2  ;;  %s228_s17 = sshll.u32 %s276_s10, 1 }
   0xd   : > { %s134_s14 = scalar_lea.vmem %s273_s1, %s227_s11  ;;  %s138_s20 = scalar_lea.vmem %s274_s2, %s228_s17 }
   0xe   : > { %v140_v0 = vld [vmem:[%s134_s14] sm:$0xf] }
   0xf   : > { %v141_v1 = vunpack.c.l.bf16 %v140_v0 }
  0x11   : > { %161 = vmatpush.msra.mxu0 %v141_v1 }
  0x12   : > { %229 = vmatmul.msk.f32.vlgmr.msra.gmra.mxu0 %vm142_vm0, %v139_v2 }
  0x8f   : > { %v163_v3 = vpop.f32.mrf.mxu0 }
  0x90   : > { %v166_v4 = vpack.c.bf16 %v163_v3, %v163_v3 }
  0x92   : > { %168 = vst.msk [vmem:[%s138_s20] sm:$0x3] %vm167_vm1, %v166_v4 }
  0x93 PF: > { %s12_s9 = sadd.s32 1, %s246_s9  }
  0x94   : > { %p9_p4 = scmp.ge.s32.totalorder %s12_s9, 10  }
  0x96   :  { %11 = sbr.rel (!%p9_p4) target bundleno = 1 (0x1), region = 58 }

// kernel: resnet_base_oc_forward.26
= control target key start
LH: loop header
LB: loop body
LE: loop exit
PB: predicated region body
PF: predicated region fallthrough
CT: control target
= control target key end

     0   :  { %vm18_vm0 = vcmask 130048   ;;  %vm32_vm1 = vcmask 122880   ;;  %s104_s0 = inlined_call_operand.vmem [shape: bf16[32,16], index: 0, kind: input, shape index: {}]   ;;  %s105_s1 = inlined_call_operand.vmem [shape: f32[1,16], index: 1, kind: output, shape index: {0}]   ;;  %s106_s2 = inlined_call_operand.vmem [shape: f32[1,16], index: 2, kind: output, shape index: {1}]  }
   0x1   :  { %v61_v0 = vld [vmem:[%s104_s0] sm:$0xff]   ;;  %v68_v1 = vld [vmem:[%s104_s0 + $0x8] sm:$0xff]  }
   0x2   :  { %v62_v2 = vunpack.c.l.bf16 %v61_v0  ;;  %v63_v3 = vunpack.c.h.bf16 %v61_v0  ;;  %v66_v4 = vunpack.c.l.bf16 %v68_v1  ;;  %v67_v5 = vunpack.c.h.bf16 %v68_v1 }
   0x4   :  { %v19_v6 = vsel %vm18_vm0, %v62_v2, 0.0  ;;  %v20_v7 = vsel %vm18_vm0, %v63_v3, 0.0  ;;  %v22_v8 = vsel %vm18_vm0, %v66_v4, 0.0  ;;  %v34_v10 = vmul.f32 %v62_v2, %v62_v2 }
   0x5   :  { %v21_v9 = vadd.f32 %v20_v7, %v19_v6  ;;  %v35_v11 = vmul.f32 %v63_v3, %v63_v3  ;;  %v36_v12 = vmul.f32 %v66_v4, %v66_v4  ;;  %v24_v13 = vsel %vm18_vm0, %v67_v5, 0.0 }
   0x6   :  { %v37_v14 = vmul.f32 %v67_v5, %v67_v5  ;;  %v38_v16 = vsel %vm18_vm0, %v34_v10, 0.0 }
   0x7   :  { %v23_v15 = vadd.f32 %v22_v8, %v21_v9  ;;  %v39_v17 = vsel %vm18_vm0, %v35_v11, 0.0  ;;  %v41_v18 = vsel %vm18_vm0, %v36_v12, 0.0 }
   0x8   :  { %v40_v19 = vadd.f32 %v39_v17, %v38_v16  ;;  %v43_v21 = vsel %vm18_vm0, %v37_v14, 0.0 }
   0x9   :  { %v25_v20 = vadd.f32 %v24_v13, %v23_v15 }
   0xa   :  { %v42_v22 = vadd.f32 %v41_v18, %v40_v19 }
   0xb   :  { %v26_v23 = vrot.slane %v25_v20, 4 }
   0xc   :  { %v44_v24 = vadd.f32 %v43_v21, %v42_v22 }
   0xd   :  { %v27_v25 = vadd.f32 %v26_v23, %v25_v20 }
   0xe   :  { %v45_v26 = vrot.slane %v44_v24, 4 }
   0xf   :  { %v28_v27 = vrot.slane %v27_v25, 2 }
  0x10   :  { %v46_v28 = vadd.f32 %v45_v26, %v44_v24 }
  0x11   :  { %v29_v29 = vadd.f32 %v28_v27, %v27_v25 }
  0x12   :  { %v47_v30 = vrot.slane %v46_v28, 2 }
  0x13   :  { %v30_v31 = vrot.slane %v29_v29, 1 }
  0x14   :  { %v48_v32 = vadd.f32 %v47_v30, %v46_v28 }
  0x15   :  { %v31_v33 = vadd.f32 %v30_v31, %v29_v29 }
  0x16   :  { %v49_v34 = vrot.slane %v48_v32, 1 }
  0x17   :  { %33 = vst.msk [vmem:[%s105_s1] sm:$0x1] %vm32_vm1, %v31_v33 }
  0x18   :  { %v50_v35 = vadd.f32 %v49_v34, %v48_v32 }
  0x1a   :  { %51 = vst.msk [vmem:[%s106_s2] sm:$0x1] %vm32_vm1, %v50_v35 }

// kernel: resnet_base_oc_forward.25
= control target key start
LH: loop header
LB: loop body
LE: loop exit
PB: predicated region body
PF: predicated region fallthrough
CT: control target
= control target key end

     0   :  { %vm84_vm0 = vcmask 1043456   ;;  %vm77_vm1 = vcmask 588800   ;;  %s241_s1 = inlined_call_operand.vmem [shape: bf16[72,128], index: 1, kind: input, shape index: {}]   ;;  %s242_s2 = inlined_call_operand.vmem [shape: f32[1,128], index: 2, kind: input, shape index: {}]   ;;  %s243_s0 = inlined_call_operand.vmem [shape: bf16[32,72], index: 0, kind: input, shape index: {}]   ;;  %s244_s3 = inlined_call_operand.vmem [shape: bf16[32,128], index: 3, kind: output, shape index: {}]  }
   0x1   :  { %v39_v0 = vld [vmem:[%s241_s1 + $0x20] sm:$0xf]  ;;  %v173_v4 = vld [vmem:[%s241_s1 + $0x18] sm:$0xff]  ;;  %v172_v5 = vld [vmem:[%s241_s1 + $0x10] sm:$0xff] }
   0x2   :  { %v67_v1 = vunpack.c.l.b16 %v39_v0  ;;  %v171_v6 = vld [vmem:[%s241_s1 + $0x8] sm:$0xff]  ;;  %v170_v7 = vld [vmem:[%s241_s1] sm:$0xff] }
   0x3   :  { %v168_v8 = vld [vmem:[%s243_s0] sm:$0xff]  ;;  %v169_v9 = vld [vmem:[%s243_s0 + $0x8] sm:$0xff] }
   0x4   :  { %v72_v2 = vpack.c.b16 %v67_v1, %v67_v1  ;;  %v190_v12 = vld [vmem:[%s242_s2] ss:$0 sm:$0xff] }
   0x6   :  { %v86_v3 = vsel %vm84_vm0, %v72_v2, 0 }
   0x7   :  { %91 = vmatpush.bf16.msra.mxu0 %v86_v3  ;;  %185 = vmatpush.bf16.msra.mxu1 %v86_v3 }
   0xb   :  { %92 = vmatpush.bf16.msra.mxu0 %v173_v4  ;;  %186 = vmatpush.bf16.msra.mxu1 %v173_v4 }
   0xf   :  { %93 = vmatpush.bf16.msra.mxu0 %v172_v5  ;;  %187 = vmatpush.bf16.msra.mxu1 %v172_v5 }
  0x13   :  { %94 = vmatpush.bf16.msra.mxu0 %v171_v6  ;;  %188 = vmatpush.bf16.msra.mxu1 %v171_v6 }
  0x17   :  { %95 = vmatpush.bf16.msra.mxu0 %v170_v7  ;;  %189 = vmatpush.bf16.msra.mxu1 %v170_v7 }
  0x1a   :  { %166 = vmatmul.msk.bf16.vlgmr.msra.gmra.mxu0 %vm77_vm1, %v168_v8  ;;  %167 = vmatmul.msk.bf16.vlgmr.msra.gmra.mxu1 %vm77_vm1, %v169_v9 }
  0x97   :  { %v97_v10 = vpop.f32.mrf.mxu0  ;;  %v102_v11 = vpop.f32.mrf.mxu1 }
  0x98   :  { %v126_v15 = vadd.f32 %v190_v12, %v97_v10  ;;  %v128_v16 = vadd.f32 %v190_v12, %v102_v11 }
  0x9f   :  { %v99_v13 = vpop.f32.mrf.mxu0  ;;  %v104_v14 = vpop.f32.mrf.mxu1 }
  0xa0   :  { %v127_v17 = vadd.f32 %v190_v12, %v99_v13  ;;  %v129_v18 = vadd.f32 %v190_v12, %v104_v14 }
  0xa2   :  { %v177_v19 = vpack.c.bf16 %v127_v17, %v126_v15  ;;  %v182_v20 = vpack.c.bf16 %v129_v18, %v128_v16 }
  0xa4   :  { %178 = vst [vmem:[%s244_s3] sm:$0xff] %v177_v19  }
  0xa5   :  { %184 = vst [vmem:[%s244_s3 + $0x8] sm:$0xff] %v182_v20  }

// kernel: resnet_base_oc_forward.27
= control target key start
LH: loop header
LB: loop body
LE: loop exit
PB: predicated region body
PF: predicated region fallthrough
CT: control target
= control target key end

     0   :  { %vm42_vm0 = vcmask 125952   ;;  %s106_s0 = inlined_call_operand.vmem [shape: bf16[32,16], index: 0, kind: input, shape index: {}]   ;;  %s107_s1 = inlined_call_operand.vmem [shape: f32[1,16], index: 1, kind: input, shape index: {}]   ;;  %s108_s2 = inlined_call_operand.vmem [shape: f32[1,16], index: 2, kind: input, shape index: {}]   ;;  %s109_s3 = inlined_call_operand.vmem [shape: bf16[32,16], index: 3, kind: output, shape index: {}]  }
   0x1   :  { %v52_v0 = vld [vmem:[%s106_s0] sm:$0xff]   ;;  %v59_v5 = vld [vmem:[%s106_s0 + $0x8] sm:$0xff]  }
   0x2   :  { %v60_v1 = vld [vmem:[%s107_s1] ss:$0 sm:$0xff]  ;;  %v53_v2 = vunpack.c.l.bf16 %v52_v0  ;;  %v54_v4 = vunpack.c.h.bf16 %v52_v0  ;;  %v57_v6 = vunpack.c.l.bf16 %v59_v5  ;;  %v58_v7 = vunpack.c.h.bf16 %v59_v5 }
   0x3   :  { %v61_v3 = vld [vmem:[%s108_s2] ss:$0 sm:$0xff] }
   0x4   :  { %v26_v8 = vmul.f32 %v60_v1, %v53_v2  ;;  %v27_v9 = vmul.f32 %v60_v1, %v54_v4  ;;  %v28_v10 = vmul.f32 %v60_v1, %v57_v6  ;;  %v29_v11 = vmul.f32 %v60_v1, %v58_v7 }
   0x6   :  { %v34_v12 = vadd.f32 %v61_v3, %v26_v8  ;;  %v35_v13 = vadd.f32 %v61_v3, %v27_v9  ;;  %v36_v14 = vadd.f32 %v61_v3, %v28_v10  ;;  %v37_v15 = vadd.f32 %v61_v3, %v29_v11 }
   0x8   :  { %v38_v16 = vpack.c.bf16 %v34_v12, %v34_v12  ;;  %v39_v17 = vpack.c.bf16 %v35_v13, %v35_v13  ;;  %v40_v18 = vpack.c.bf16 %v36_v14, %v36_v14  ;;  %v41_v19 = vpack.c.bf16 %v37_v15, %v37_v15 }
   0xa   :  { %43 = vst.msk [vmem:[%s109_s3] sm:$0xf] %vm42_vm0, %v38_v16 }
   0xb   :  { %44 = vst.msk [vmem:[%s109_s3 + $0x4] sm:$0xf] %vm42_vm0, %v39_v17 }
   0xc   :  { %45 = vst.msk [vmem:[%s109_s3 + $0x8] sm:$0xf] %vm42_vm0, %v40_v18 }
   0xd   :  { %46 = vst.msk [vmem:[%s109_s3 + $0xc] sm:$0xf] %vm42_vm0, %v41_v19 }

// kernel: resnet_base_oc_forward.28
= control target key start
LH: loop header
LB: loop body
LE: loop exit
PB: predicated region body
PF: predicated region fallthrough
CT: control target
= control target key end

     0   :  { %vm49_vm0 = vcmask 130048   ;;  %s178_s1 = inlined_call_operand.vmem [shape: bf16[16,128], index: 1, kind: input, shape index: {}]   ;;  %s179_s0 = inlined_call_operand.vmem [shape: bf16[32,16], index: 0, kind: input, shape index: {}]   ;;  %s180_s2 = inlined_call_operand.vmem [shape: f32[1,128], index: 2, kind: input, shape index: {}]   ;;  %s181_s3 = inlined_call_operand.vmem [shape: bf16[32,128], index: 3, kind: output, shape index: {}]  }
   0x1   :  { %v126_v0 = vld [vmem:[%s178_s1] sm:$0xff]  ;;  %v125_v2 = vld [vmem:[%s179_s0 + $0x8] sm:$0xff] }
   0x2   :  { %v124_v1 = vld [vmem:[%s179_s0] sm:$0xff]  ;;  %63 = vmatpush.bf16.msra.mxu0 %v126_v0  ;;  %138 = vmatpush.bf16.msra.mxu1 %v126_v0 }
   0x3   :  { %v139_v5 = vld [vmem:[%s180_s2] ss:$0 sm:$0xff] }
   0x5   :  { %122 = vmatmul.msk.bf16.vlgmr.msra.gmra.mxu0 %vm49_vm0, %v124_v1  ;;  %123 = vmatmul.msk.bf16.vlgmr.msra.gmra.mxu1 %vm49_vm0, %v125_v2 }
  0x82   :  { %v65_v3 = vpop.f32.mrf.mxu0  ;;  %v70_v4 = vpop.f32.mrf.mxu1 }
  0x83   :  { %v94_v8 = vadd.f32 %v139_v5, %v65_v3  ;;  %v96_v9 = vadd.f32 %v139_v5, %v70_v4 }
  0x8a   :  { %v67_v6 = vpop.f32.mrf.mxu0  ;;  %v72_v7 = vpop.f32.mrf.mxu1 }
  0x8b   :  { %v95_v10 = vadd.f32 %v139_v5, %v67_v6  ;;  %v97_v11 = vadd.f32 %v139_v5, %v72_v7 }
  0x8d   :  { %v130_v12 = vpack.c.bf16 %v95_v10, %v94_v8  ;;  %v135_v13 = vpack.c.bf16 %v97_v11, %v96_v9 }
  0x8f   :  { %131 = vst [vmem:[%s181_s3] sm:$0xff] %v130_v12  }
  0x90   :  { %137 = vst [vmem:[%s181_s3 + $0x8] sm:$0xff] %v135_v13  }

// kernel: resnet_base_oc_forward.29
= control target key start
LH: loop header
LB: loop body
LE: loop exit
PB: predicated region body
PF: predicated region fallthrough
CT: control target
= control target key end

     0   :  { %vm18_vm0 = vcmask 64512   ;;  %vm32_vm1 = vcmask 57344   ;;  %s104_s0 = inlined_call_operand.vmem [shape: bf16[32,8], index: 0, kind: input, shape index: {}]   ;;  %s105_s1 = inlined_call_operand.vmem [shape: f32[1,8], index: 1, kind: output, shape index: {0}]   ;;  %s106_s2 = inlined_call_operand.vmem [shape: f32[1,8], index: 2, kind: output, shape index: {1}]  }
   0x1   :  { %v61_v0 = vld [vmem:[%s104_s0] sm:$0xff]   ;;  %v68_v1 = vld [vmem:[%s104_s0 + $0x8] sm:$0xff]  }
   0x2   :  { %v62_v2 = vunpack.c.l.bf16 %v61_v0  ;;  %v63_v3 = vunpack.c.h.bf16 %v61_v0  ;;  %v66_v4 = vunpack.c.l.bf16 %v68_v1  ;;  %v67_v5 = vunpack.c.h.bf16 %v68_v1 }
   0x4   :  { %v19_v6 = vsel %vm18_vm0, %v62_v2, 0.0  ;;  %v20_v7 = vsel %vm18_vm0, %v63_v3, 0.0  ;;  %v22_v8 = vsel %vm18_vm0, %v66_v4, 0.0  ;;  %v34_v10 = vmul.f32 %v62_v2, %v62_v2 }
   0x5   :  { %v21_v9 = vadd.f32 %v20_v7, %v19_v6  ;;  %v35_v11 = vmul.f32 %v63_v3, %v63_v3  ;;  %v36_v12 = vmul.f32 %v66_v4, %v66_v4  ;;  %v24_v13 = vsel %vm18_vm0, %v67_v5, 0.0 }
   0x6   :  { %v37_v14 = vmul.f32 %v67_v5, %v67_v5  ;;  %v38_v16 = vsel %vm18_vm0, %v34_v10, 0.0 }
   0x7   :  { %v23_v15 = vadd.f32 %v22_v8, %v21_v9  ;;  %v39_v17 = vsel %vm18_vm0, %v35_v11, 0.0  ;;  %v41_v18 = vsel %vm18_vm0, %v36_v12, 0.0 }
   0x8   :  { %v40_v19 = vadd.f32 %v39_v17, %v38_v16  ;;  %v43_v21 = vsel %vm18_vm0, %v37_v14, 0.0 }
   0x9   :  { %v25_v20 = vadd.f32 %v24_v13, %v23_v15 }
   0xa   :  { %v42_v22 = vadd.f32 %v41_v18, %v40_v19 }
   0xb   :  { %v26_v23 = vrot.slane %v25_v20, 4 }
   0xc   :  { %v44_v24 = vadd.f32 %v43_v21, %v42_v22 }
   0xd   :  { %v27_v25 = vadd.f32 %v26_v23, %v25_v20 }
   0xe   :  { %v45_v26 = vrot.slane %v44_v24, 4 }
   0xf   :  { %v28_v27 = vrot.slane %v27_v25, 2 }
  0x10   :  { %v46_v28 = vadd.f32 %v45_v26, %v44_v24 }
  0x11   :  { %v29_v29 = vadd.f32 %v28_v27, %v27_v25 }
  0x12   :  { %v47_v30 = vrot.slane %v46_v28, 2 }
  0x13   :  { %v30_v31 = vrot.slane %v29_v29, 1 }
  0x14   :  { %v48_v32 = vadd.f32 %v47_v30, %v46_v28 }
  0x15   :  { %v31_v33 = vadd.f32 %v30_v31, %v29_v29 }
  0x16   :  { %v49_v34 = vrot.slane %v48_v32, 1 }
  0x17   :  { %33 = vst.msk [vmem:[%s105_s1] sm:$0x1] %vm32_vm1, %v31_v33 }
  0x18   :  { %v50_v35 = vadd.f32 %v49_v34, %v48_v32 }
  0x1a   :  { %51 = vst.msk [vmem:[%s106_s2] sm:$0x1] %vm32_vm1, %v50_v35 }

// kernel: resnet_base_oc_forward.30
= control target key start
LH: loop header
LB: loop body
LE: loop exit
PB: predicated region body
PF: predicated region fallthrough
CT: control target
= control target key end

     0   :  { %vm46_vm0 = vcmask 60416   ;;  %s110_s0 = inlined_call_operand.vmem [shape: bf16[32,8], index: 0, kind: input, shape index: {}]   ;;  %s111_s1 = inlined_call_operand.vmem [shape: f32[1,8], index: 1, kind: input, shape index: {}]   ;;  %s112_s2 = inlined_call_operand.vmem [shape: f32[1,8], index: 2, kind: input, shape index: {}]   ;;  %s113_s3 = inlined_call_operand.vmem [shape: bf16[32,8], index: 3, kind: output, shape index: {}]  }
   0x1   :  { %v56_v0 = vld [vmem:[%s110_s0] sm:$0xff]   ;;  %v63_v5 = vld [vmem:[%s110_s0 + $0x8] sm:$0xff]  }
   0x2   :  { %v64_v1 = vld [vmem:[%s111_s1] ss:$0 sm:$0xff]  ;;  %v57_v2 = vunpack.c.l.bf16 %v56_v0  ;;  %v58_v4 = vunpack.c.h.bf16 %v56_v0  ;;  %v61_v6 = vunpack.c.l.bf16 %v63_v5  ;;  %v62_v7 = vunpack.c.h.bf16 %v63_v5 }
   0x3   :  { %v65_v3 = vld [vmem:[%s112_s2] ss:$0 sm:$0xff] }
   0x4   :  { %v26_v8 = vmul.f32 %v64_v1, %v57_v2  ;;  %v27_v9 = vmul.f32 %v64_v1, %v58_v4  ;;  %v28_v10 = vmul.f32 %v64_v1, %v61_v6  ;;  %v29_v11 = vmul.f32 %v64_v1, %v62_v7 }
   0x6   :  { %v34_v12 = vadd.f32 %v65_v3, %v26_v8  ;;  %v35_v13 = vadd.f32 %v65_v3, %v27_v9  ;;  %v36_v14 = vadd.f32 %v65_v3, %v28_v10  ;;  %v37_v15 = vadd.f32 %v65_v3, %v29_v11 }
   0x8   :  { %v38_v16 = vmax.f32 %v34_v12, 0.0  ;;  %v39_v17 = vmax.f32 %v35_v13, 0.0  ;;  %v40_v18 = vmax.f32 %v36_v14, 0.0  ;;  %v41_v19 = vmax.f32 %v37_v15, 0.0 }
   0xa   :  { %v42_v20 = vpack.c.bf16 %v38_v16, %v38_v16  ;;  %v43_v21 = vpack.c.bf16 %v39_v17, %v39_v17  ;;  %v44_v22 = vpack.c.bf16 %v40_v18, %v40_v18  ;;  %v45_v23 = vpack.c.bf16 %v41_v19, %v41_v19 }
   0xc   :  { %47 = vst.msk [vmem:[%s113_s3] sm:$0xf] %vm46_vm0, %v42_v20 }
   0xd   :  { %48 = vst.msk [vmem:[%s113_s3 + $0x4] sm:$0xf] %vm46_vm0, %v43_v21 }
   0xe   :  { %49 = vst.msk [vmem:[%s113_s3 + $0x8] sm:$0xf] %vm46_vm0, %v44_v22 }
   0xf   :  { %50 = vst.msk [vmem:[%s113_s3 + $0xc] sm:$0xf] %vm46_vm0, %v45_v23 }

// kernel: resnet_base_oc_forward.32
= control target key start
LH: loop header
LB: loop body
LE: loop exit
PB: predicated region body
PF: predicated region fallthrough
CT: control target
= control target key end

     0   :  { %s710_s12 = smov 0   ;;  %s712_s13 = smov 0   ;;  %s774_s0 = inlined_call_operand.vmem [shape: bf16[2,16,8], index: 0, kind: input, shape index: {}, may-alias: {0,1}]   ;;  %s775_s1 = inlined_call_operand.vmem [shape: bf16[2,16,8], index: 1, kind: input, shape index: {}, may-alias: {0,1}]   ;;  %s776_s2 = inlined_call_operand.vmem [shape: bf16[2,16,8], index: 2, kind: input, shape index: {}]   ;;  %s777_s3 = inlined_call_operand.vmem [shape: bf16[2,16,8], index: 3, kind: output, shape index: {}]  }
   0x1   :  { %s714_s14 = smov 0  }
   0x2 LB: > { %s32_s15 = sadd.s32 1, %s681_s13  ;;  %p589_p0 = scmp.ge.s32.totalorder %s685_s14, 1  ;;  %s685_s14 = sphi %s714_s14, %s13_s14   ;;  %s681_s13 = sphi %s712_s13, %s779_s13   ;;  %s677_s12 = sphi %s710_s12, %s778_s12  }
   0x3   : > { %p34_p1 = scmp.ge.s32.totalorder %s32_s15, 2  ;;  %p199_p2 = scmp.lt.s32.totalorder %s685_s14, 3 }
   0x5   : > { %s781_s15 = smov (%p34_p1, %s32_s15), 0  ;;  %p200_p3 = pnand %p589_p0, %p199_p2 }
   0x6   : > { %p250_p4 = scmp.lt.s32.totalorder (!%p200_p3), %s677_s12, 1 }
   0x7   : > { %203 = sbr.rel (%p200_p3) target bundleno = 659 (0x293), region = 32 }
   0xc   : > { %vm299_vm0 = vcmask 64512   ;;  %v687_v0 = vmov 0.0   ;;  %s783_s12 = smov (!%p250_p4, %s677_s12), 1  ;;  %vm294_vm1 = vcmask 7168   ;;  %v688_v4 = vmov -inf  }
   0xd   : > { %300 = vst.msk [vmem:[#allocation4] sm:$0xff] %vm299_vm0, %v687_v0  ;;  %s730_s16 = sshll.u32 %s783_s12, 3  ;;  %vm343_vm2 = vcmask 130048   ;;  %v689_v11 = vmov 0   ;;  %vm456_vm3 = vcmask 60416  }
   0xe   : > { %301 = vst.msk [vmem:[#allocation4 + $0x8] sm:$0xff] %vm299_vm0, %v687_v0  ;;  %s267_s19 = scalar_lea.vmem %s775_s1, %s730_s16  ;;  %s257_s22 = scalar_lea.vmem %s774_s0, %s730_s16  ;;  %648 = vset.pattern.permute.xlu1 %v689_v11  ;;  %649 = vset.pattern.permute.xlu0 %v689_v11 }
   0xf   : > { %v619_v1 = vld [vmem:[%s267_s19] sm:$0xff]  ;;  %295 = vst.msk [vmem:[#allocation2] sm:$0xff] %vm294_vm1, %v688_v4  ;;  %650 = vset.pattern.permute.xlu2 %v689_v11  ;;  %s277_s25 = scalar_lea.vmem %s776_s2, %s730_s16  ;;  %s287_s28 = scalar_lea.vmem %s777_s3, %s730_s16 }
  0x10   : > { %v323_v2 = vsel %vm299_vm0, %v619_v1, 0  ;;  %v618_v3 = vld [vmem:[%s257_s22] sm:$0xff]  ;;  %296 = vst.msk [vmem:[#allocation2 + $0x8] sm:$0xff] %vm294_vm1, %v688_v4 }
  0x11   : > { %332 = vmatpush.bf16.xpose.msra.mxu0 %v323_v2  ;;  %297 = vst.msk [vmem:[#allocation3] sm:$0xff] %vm294_vm1, %v687_v0  ;;  %v620_v24 = vld [vmem:[%s277_s25] sm:$0xff] }
  0x12   : > { %298 = vst.msk [vmem:[#allocation3 + $0x8] sm:$0xff] %vm294_vm1, %v687_v0  ;;  %420 = vmatpush.bf16.msra.mxu1 %v620_v24 }
  0x14   : > { %v389_v45 = vld [vmem:[#allocation4] sm:$0xff] }
  0x15   : > { %v390_v52 = vld [vmem:[#allocation4 + $0x8] sm:$0xff] }
  0x16   : > { %v341_v12 = vld [vmem:[#allocation2] sm:$0xff] }
  0x17   : > { %v342_v17 = vld [vmem:[#allocation2 + $0x8] sm:$0xff] }
  0x18   : > { %606 = vmatmul.msk.bf16.vlgmr.msra.gmra.mxu0 %vm299_vm0, %v618_v3  ;;  %v374_v36 = vld [vmem:[#allocation3] sm:$0xff] }
  0x19   : > { %v375_v40 = vld [vmem:[#allocation3 + $0x8] sm:$0xff] }
  0x95   : > { %v334_v5 = vpop.f32.mrf.mxu0 }
  0x96   : > { %v339_v6 = vmul.f32 0.35355338, %v334_v5 }
  0x98   : > { %v344_v7 = vsel %vm343_vm2, %v339_v6, -inf }
  0x99   : > { %345 = vmax.xlane.f32.xlu0 %v344_v7 }
  0x9d   : > { %v336_v8 = vpop.f32.mrf.mxu0 }
  0x9e   : > { %v340_v9 = vmul.f32 0.35355338, %v336_v8 }
  0xa0   : > { %v347_v10 = vsel %vm343_vm2, %v340_v9, -inf }
  0xa1   : > { %348 = vmax.xlane.f32.xlu0 %v347_v10 }
 0x10c   : > { %v346_v13 = vpop.xlane.xlu0 %345 }
 0x10d   : > { %v350_v14 = vmax.f32 %v341_v12, %v346_v13 }
 0x10f   : > { %v352_v15 = vsub.f32 %v341_v12, %v350_v14  ;;  %431 = vst.msk [vmem:[#allocation2] sm:$0xff] %vm294_vm1, %v350_v14  ;;  %360 = vperm.xlu1 %648, %v350_v14  }
 0x111   : > { %v354_v16 = vmul.f32 1.442695, %v352_v15 }
 0x113   : > { %651 = vpow2.f32 %v354_v16 }
 0x114   : > { %v349_v18 = vpop.xlane.xlu0 %348 }
 0x115   : > { %v351_v19 = vmax.f32 %v342_v17, %v349_v18 }
 0x117   : > { %v353_v20 = vsub.f32 %v342_v17, %v351_v19  ;;  %432 = vst.msk [vmem:[#allocation2 + $0x8] sm:$0xff] %vm294_vm1, %v351_v19  ;;  %365 = vperm.xlu1 %648, %v351_v19  }
 0x119   : > { %v652_v21 = vpop.eup %651  ;;  %v356_v22 = vmul.f32 1.442695, %v353_v20 }
 0x11a   : > { %393 = vperm.xlu0 %649, %v652_v21   ;;  %v376_v37 = vmul.f32 %v652_v21, %v374_v36 }
 0x11b   : > { %653 = vpow2.f32 %v356_v22 }
 0x121   : > { %v654_v23 = vpop.eup %653 }
 0x122   : > { %398 = vperm.xlu1 %648, %v654_v23   ;;  %v377_v41 = vmul.f32 %v654_v23, %v375_v40 }
 0x181   : > { %v361_v25 = vpop.permute.xlu1 %360 }
 0x182   : > { %v368_v26 = vsub.f32 %v339_v6, %v361_v25 }
 0x184   : > { %v370_v27 = vmul.f32 1.442695, %v368_v26 }
 0x186   : > { %655 = vpow2.f32 %v370_v27 }
 0x189   : > { %v366_v28 = vpop.permute.xlu1 %365 }
 0x18a   : > { %v369_v29 = vsub.f32 %v340_v9, %v366_v28 }
 0x18c   : > { %v656_v30 = vpop.eup %655  ;;  %v372_v31 = vmul.f32 1.442695, %v369_v29  ;;  %v394_v46 = vpop.permute.xlu0 %393 }
 0x18d   : > { %v378_v32 = vsel %vm343_vm2, %v656_v30, 0.0  ;;  %v401_v48 = vmul.f32 %v394_v46, %v389_v45 }
 0x18e   : > { %657 = vpow2.f32 %v372_v31  ;;  %379 = vadd.xlane.f32.xlu2 %v378_v32 }
 0x194   : > { %v658_v33 = vpop.eup %657  ;;  %v399_v53 = vpop.permute.xlu1 %398 }
 0x195   : > { %v381_v34 = vsel %vm343_vm2, %v658_v33, 0.0  ;;  %v403_v35 = vpack.c.bf16 %v658_v33, %v656_v30  ;;  %v402_v55 = vmul.f32 %v399_v53, %v390_v52 }
 0x196   : > { %382 = vadd.xlane.f32.xlu2 %v381_v34 }
 0x197   : > { %611 = vmatmul.msk.bf16.vlgmr.msra.gmra.mxu1 %vm343_vm2, %v403_v35 }
 0x201   : > { %v380_v38 = vpop.xlane.xlu2 %379 }
 0x202   : > { %v384_v39 = vadd.f32 %v380_v38, %v376_v37 }
 0x204   : > { %387 = vst.msk [vmem:[#allocation3] sm:$0xff] %vm294_vm1, %v384_v39 }
 0x209   : > { %v383_v42 = vpop.xlane.xlu2 %382 }
 0x20a   : > { %v385_v43 = vadd.f32 %v383_v42, %v377_v41 }
 0x20b   : > { %v438_v44 = vld [vmem:[#allocation3] sm:$0xff] }
 0x20c   : > { %388 = vst.msk [vmem:[#allocation3 + $0x8] sm:$0xff] %vm294_vm1, %v385_v43  ;;  %659 = vrcp.f32 %v438_v44 }
 0x212   : > { %v660_v47 = vpop.eup %659 }
 0x213   : > { %444 = vperm.xlu2 %650, %v660_v47   ;;  %v439_v49 = vld [vmem:[#allocation3 + $0x8] sm:$0xff] }
 0x214   : > { %v422_v50 = vpop.f32.mrf.mxu1  ;;  %661 = vrcp.f32 %v439_v49 }
 0x215   : > { %v427_v51 = vadd.f32 %v422_v50, %v401_v48 }
 0x217   : > { %429 = vst.msk [vmem:[#allocation4] sm:$0xff] %vm299_vm0, %v427_v51 }
 0x21a   : > { %v662_v54 = vpop.eup %661 }
 0x21b   : > { %449 = vperm.xlu1 %648, %v662_v54  }
 0x21c   : > { %v424_v56 = vpop.f32.mrf.mxu1 }
 0x21d   : > { %v428_v57 = vadd.f32 %v424_v56, %v402_v55 }
 0x21e   : > { %v436_v59 = vld [vmem:[#allocation4] sm:$0xff] }
 0x21f   : > { %430 = vst.msk [vmem:[#allocation4 + $0x8] sm:$0xff] %vm299_vm0, %v428_v57 }
 0x226   : > { %v437_v62 = vld [vmem:[#allocation4 + $0x8] sm:$0xff] }
 0x26d   : > { %v445_v58 = vpop.permute.xlu2 %444 }
 0x26e   : > { %v452_v60 = vmul.f32 %v445_v58, %v436_v59 }
 0x270   : > { %v454_v61 = vpack.c.bf16 %v452_v60, %v452_v60 }
 0x272   : > { %457 = vst.msk [vmem:[%s287_s28] sm:$0xf] %vm456_vm3, %v454_v61 }
 0x28d   : > { %v450_v63 = vpop.permute.xlu1 %449 }
 0x28e   : > { %v453_v0 = vmul.f32 %v450_v63, %v437_v62 }
 0x290   : > { %v455_v1 = vpack.c.bf16 %v453_v0, %v453_v0 }
 0x292   : > { %458 = vst.msk [vmem:[%s287_s28 + $0x4] sm:$0xf] %vm456_vm3, %v455_v1 }
 0x293 PF: > { %s13_s14 = sadd.s32 1, %s685_s14   ;;  %s778_s12 = smov %s681_s13 }
 0x294   : > { %p10_p5 = scmp.ge.s32.totalorder %s13_s14, 4   ;;  %s779_s13 = smov %s781_s15 }
 0x296   :  { %12 = sbr.rel (!%p10_p5) target bundleno = 2 (0x2), region = 76 }

// kernel: resnet_base_oc_forward.33
= control target key start
LH: loop header
LB: loop body
LE: loop exit
PB: predicated region body
PF: predicated region fallthrough
CT: control target
= control target key end

     0   :  { %vm49_vm0 = vcmask 1043456   ;;  %vm42_vm1 = vcmask 64512   ;;  %s170_s1 = inlined_call_operand.vmem [shape: bf16[8,128], index: 1, kind: input, shape index: {}]   ;;  %s171_s0 = inlined_call_operand.vmem [shape: bf16[32,8], index: 0, kind: input, shape index: {}]   ;;  %s172_s2 = inlined_call_operand.vmem [shape: f32[1,128], index: 2, kind: input, shape index: {}]   ;;  %s173_s3 = inlined_call_operand.vmem [shape: bf16[32,128], index: 3, kind: output, shape index: {}]  }
   0x1   :  { %v31_v0 = vld [vmem:[%s170_s1] sm:$0xf]  ;;  %v118_v3 = vld [vmem:[%s171_s0 + $0x8] sm:$0xff] }
   0x2   :  { %v51_v1 = vsel %vm49_vm0, %v31_v0, 0  ;;  %v117_v2 = vld [vmem:[%s171_s0] sm:$0xff] }
   0x3   :  { %60 = vmatpush.bf16.msra.mxu0 %v51_v1  ;;  %130 = vmatpush.bf16.msra.mxu1 %v51_v1  ;;  %v131_v6 = vld [vmem:[%s172_s2] ss:$0 sm:$0xff] }
   0x6   :  { %115 = vmatmul.msk.bf16.vlgmr.msra.gmra.mxu0 %vm42_vm1, %v117_v2  ;;  %116 = vmatmul.msk.bf16.vlgmr.msra.gmra.mxu1 %vm42_vm1, %v118_v3 }
  0x83   :  { %v62_v4 = vpop.f32.mrf.mxu0  ;;  %v67_v5 = vpop.f32.mrf.mxu1 }
  0x84   :  { %v91_v9 = vadd.f32 %v131_v6, %v62_v4  ;;  %v93_v10 = vadd.f32 %v131_v6, %v67_v5 }
  0x8b   :  { %v64_v7 = vpop.f32.mrf.mxu0  ;;  %v69_v8 = vpop.f32.mrf.mxu1 }
  0x8c   :  { %v92_v11 = vadd.f32 %v131_v6, %v64_v7  ;;  %v94_v12 = vadd.f32 %v131_v6, %v69_v8 }
  0x8e   :  { %v122_v13 = vpack.c.bf16 %v92_v11, %v91_v9  ;;  %v127_v14 = vpack.c.bf16 %v94_v12, %v93_v10 }
  0x90   :  { %123 = vst [vmem:[%s173_s3] sm:$0xff] %v122_v13  }
  0x91   :  { %129 = vst [vmem:[%s173_s3 + $0x8] sm:$0xff] %v127_v14  }

// kernel: resnet_base_oc_forward.36
= control target key start
LH: loop header
LB: loop body
LE: loop exit
PB: predicated region body
PF: predicated region fallthrough
CT: control target
= control target key end

     0   :  { %vm46_vm0 = vcmask 125952   ;;  %s110_s0 = inlined_call_operand.vmem [shape: bf16[32,16], index: 0, kind: input, shape index: {}]   ;;  %s111_s1 = inlined_call_operand.vmem [shape: f32[1,16], index: 1, kind: input, shape index: {}]   ;;  %s112_s2 = inlined_call_operand.vmem [shape: f32[1,16], index: 2, kind: input, shape index: {}]   ;;  %s113_s3 = inlined_call_operand.vmem [shape: bf16[32,16], index: 3, kind: output, shape index: {}]  }
   0x1   :  { %v56_v0 = vld [vmem:[%s110_s0] sm:$0xff]   ;;  %v63_v5 = vld [vmem:[%s110_s0 + $0x8] sm:$0xff]  }
   0x2   :  { %v64_v1 = vld [vmem:[%s111_s1] ss:$0 sm:$0xff]  ;;  %v57_v2 = vunpack.c.l.bf16 %v56_v0  ;;  %v58_v4 = vunpack.c.h.bf16 %v56_v0  ;;  %v61_v6 = vunpack.c.l.bf16 %v63_v5  ;;  %v62_v7 = vunpack.c.h.bf16 %v63_v5 }
   0x3   :  { %v65_v3 = vld [vmem:[%s112_s2] ss:$0 sm:$0xff] }
   0x4   :  { %v26_v8 = vmul.f32 %v64_v1, %v57_v2  ;;  %v27_v9 = vmul.f32 %v64_v1, %v58_v4  ;;  %v28_v10 = vmul.f32 %v64_v1, %v61_v6  ;;  %v29_v11 = vmul.f32 %v64_v1, %v62_v7 }
   0x6   :  { %v34_v12 = vadd.f32 %v65_v3, %v26_v8  ;;  %v35_v13 = vadd.f32 %v65_v3, %v27_v9  ;;  %v36_v14 = vadd.f32 %v65_v3, %v28_v10  ;;  %v37_v15 = vadd.f32 %v65_v3, %v29_v11 }
   0x8   :  { %v38_v16 = vmax.f32 %v34_v12, 0.0  ;;  %v39_v17 = vmax.f32 %v35_v13, 0.0  ;;  %v40_v18 = vmax.f32 %v36_v14, 0.0  ;;  %v41_v19 = vmax.f32 %v37_v15, 0.0 }
   0xa   :  { %v42_v20 = vpack.c.bf16 %v38_v16, %v38_v16  ;;  %v43_v21 = vpack.c.bf16 %v39_v17, %v39_v17  ;;  %v44_v22 = vpack.c.bf16 %v40_v18, %v40_v18  ;;  %v45_v23 = vpack.c.bf16 %v41_v19, %v41_v19 }
   0xc   :  { %47 = vst.msk [vmem:[%s113_s3] sm:$0xf] %vm46_vm0, %v42_v20 }
   0xd   :  { %48 = vst.msk [vmem:[%s113_s3 + $0x4] sm:$0xf] %vm46_vm0, %v43_v21 }
   0xe   :  { %49 = vst.msk [vmem:[%s113_s3 + $0x8] sm:$0xf] %vm46_vm0, %v44_v22 }
   0xf   :  { %50 = vst.msk [vmem:[%s113_s3 + $0xc] sm:$0xf] %vm46_vm0, %v45_v23 }

// kernel: resnet_base_oc_forward.34
= control target key start
LH: loop header
LB: loop body
LE: loop exit
PB: predicated region body
PF: predicated region fallthrough
CT: control target
= control target key end

     0   :  { %vm57_vm0 = vcmask 261120   ;;  %s195_s1 = inlined_call_operand.vmem [shape: bf16[32,128], index: 1, kind: input, shape index: {}]   ;;  %s196_s2 = inlined_call_operand.vmem [shape: f32[1,128], index: 2, kind: input, shape index: {}]   ;;  %s197_s0 = inlined_call_operand.vmem [shape: bf16[32,32], index: 0, kind: input, shape index: {}]   ;;  %s198_s3 = inlined_call_operand.vmem [shape: bf16[32,128], index: 3, kind: output, shape index: {}]  }
   0x1   :  { %v139_v0 = vld [vmem:[%s195_s1 + $0x8] sm:$0xff]  ;;  %v138_v1 = vld [vmem:[%s195_s1] sm:$0xff] }
   0x2   :  { %70 = vmatpush.bf16.msra.mxu0 %v139_v0  ;;  %151 = vmatpush.bf16.msra.mxu1 %v139_v0  ;;  %v136_v2 = vld [vmem:[%s197_s0] sm:$0xff]  ;;  %v137_v3 = vld [vmem:[%s197_s0 + $0x8] sm:$0xff] }
   0x3   :  { %v153_v6 = vld [vmem:[%s196_s2] ss:$0 sm:$0xff] }
   0x6   :  { %71 = vmatpush.bf16.msra.mxu0 %v138_v1  ;;  %152 = vmatpush.bf16.msra.mxu1 %v138_v1 }
   0x9   :  { %134 = vmatmul.msk.bf16.vlgmr.msra.gmra.mxu0 %vm57_vm0, %v136_v2  ;;  %135 = vmatmul.msk.bf16.vlgmr.msra.gmra.mxu1 %vm57_vm0, %v137_v3 }
  0x86   :  { %v73_v4 = vpop.f32.mrf.mxu0  ;;  %v78_v5 = vpop.f32.mrf.mxu1 }
  0x87   :  { %v102_v9 = vadd.f32 %v153_v6, %v73_v4  ;;  %v104_v10 = vadd.f32 %v153_v6, %v78_v5 }
  0x8e   :  { %v75_v7 = vpop.f32.mrf.mxu0  ;;  %v80_v8 = vpop.f32.mrf.mxu1 }
  0x8f   :  { %v103_v11 = vadd.f32 %v153_v6, %v75_v7  ;;  %v105_v12 = vadd.f32 %v153_v6, %v80_v8 }
  0x91   :  { %v143_v13 = vpack.c.bf16 %v103_v11, %v102_v9  ;;  %v148_v14 = vpack.c.bf16 %v105_v12, %v104_v10 }
  0x93   :  { %144 = vst [vmem:[%s198_s3] sm:$0xff] %v143_v13  }
  0x94   :  { %150 = vst [vmem:[%s198_s3 + $0x8] sm:$0xff] %v148_v14  }

// kernel: resnet_base_oc_forward.37
= control target key start
LH: loop header
LB: loop body
LE: loop exit
PB: predicated region body
PF: predicated region fallthrough
CT: control target
= control target key end

     0   :  { %vm49_vm0 = vcmask 130048   ;;  %s169_s1 = inlined_call_operand.vmem [shape: bf16[16,128], index: 1, kind: input, shape index: {}]   ;;  %s170_s0 = inlined_call_operand.vmem [shape: bf16[32,16], index: 0, kind: input, shape index: {}]   ;;  %s171_s2 = inlined_call_operand.vmem [shape: f32[1,128], index: 2, kind: input, shape index: {}]   ;;  %s172_s3 = inlined_call_operand.vmem [shape: f32[32,128], index: 3, kind: output, shape index: {}]  }
   0x1   :  { %v122_v0 = vld [vmem:[%s169_s1] sm:$0xff]  ;;  %v121_v2 = vld [vmem:[%s170_s0 + $0x8] sm:$0xff] }
   0x2   :  { %v120_v1 = vld [vmem:[%s170_s0] sm:$0xff]  ;;  %63 = vmatpush.bf16.msra.mxu0 %v122_v0  ;;  %123 = vmatpush.bf16.msra.mxu1 %v122_v0 }
   0x3   :  { %v124_v3 = vld [vmem:[%s171_s2] ss:$0 sm:$0xff] }
   0x5   :  { %118 = vmatmul.msk.bf16.vlgmr.msra.gmra.mxu0 %vm49_vm0, %v120_v1  ;;  %119 = vmatmul.msk.bf16.vlgmr.msra.gmra.mxu1 %vm49_vm0, %v121_v2 }
  0x82   :  { %v65_v4 = vpop.f32.mrf.mxu0  ;;  %v70_v5 = vpop.f32.mrf.mxu1 }
  0x83   :  { %v94_v6 = vadd.f32 %v124_v3, %v65_v4  ;;  %v96_v7 = vadd.f32 %v124_v3, %v70_v5 }
  0x85   :  { %98 = vst [vmem:[%s172_s3] sm:$0xff] %v94_v6 }
  0x86   :  { %100 = vst [vmem:[%s172_s3 + $0x10] sm:$0xff] %v96_v7 }
  0x8a   :  { %v67_v8 = vpop.f32.mrf.mxu0  ;;  %v72_v9 = vpop.f32.mrf.mxu1 }
  0x8b   :  { %v95_v10 = vadd.f32 %v124_v3, %v67_v8  ;;  %v97_v11 = vadd.f32 %v124_v3, %v72_v9 }
  0x8d   :  { %99 = vst [vmem:[%s172_s3 + $0x8] sm:$0xff] %v95_v10 }
  0x8e   :  { %101 = vst [vmem:[%s172_s3 + $0x18] sm:$0xff] %v97_v11 }

// kernel: resnet_base_oc_forward.38
= control target key start
LH: loop header
LB: loop body
LE: loop exit
PB: predicated region body
PF: predicated region fallthrough
CT: control target
= control target key end

     0   :  { %s370_s9 = smov 0   ;;  %s372_s10 = smov 0   ;;  %s406_s0 = inlined_call_operand.vmem [shape: f32[16,4], index: 0, kind: input, shape index: {}]   ;;  %s407_s1 = inlined_call_operand.vmem [shape: f32[2,4,20], index: 1, kind: input, shape index: {}]   ;;  %s408_s2 = inlined_call_operand.vmem [shape: f32[2,16,20], index: 2, kind: output, shape index: {}]  }
   0x1   :  { %s374_s11 = smov 0  }
   0x2 LB: > { %s24_s12 = sadd.s32 1, %s349_s10  ;;  %p296_p0 = scmp.ge.s32.totalorder %s353_s11, 1  ;;  %s353_s11 = sphi %s374_s11, %s12_s11   ;;  %s349_s10 = sphi %s372_s10, %s410_s10   ;;  %s345_s9 = sphi %s370_s9, %s409_s9  }
   0x3   : > { %p26_p1 = scmp.ge.s32.totalorder %s24_s12, 2  ;;  %p130_p2 = scmp.lt.s32.totalorder %s353_s11, 3 }
   0x5   : > { %s412_s12 = smov (%p26_p1, %s24_s12), 0  ;;  %p131_p3 = pnand %p296_p0, %p130_p2 }
   0x6   : > { %p157_p4 = scmp.lt.s32.totalorder (!%p131_p3), %s345_s9, 1 }
   0x7   : > { %134 = sbr.rel (%p131_p3) target bundleno = 145 (0x91), region = 28 }
   0xc   : > { %s414_s9 = smov (!%p157_p4, %s345_s9), 1  ;;  %vm182_vm0 = vcmask 1043456   ;;  %v172_v0 = vld [vmem:[%s406_s0] sm:$0xff]  ;;  %vm175_vm1 = vcmask 31744   ;;  %v173_v1 = vld [vmem:[%s406_s0 + $0x8] sm:$0xff]  ;;  %vm209_vm2 = vcmask 162816  }
   0xd   : > { %s297_s13 = sshll.u32 %s414_s9, 2  ;;  %s305_s21 = sshll.u32 %s414_s9, 4 }
   0xe   : > { %s163_s16 = scalar_lea.vmem %s407_s1, %s297_s13  ;;  %s171_s24 = scalar_lea.vmem %s408_s2, %s305_s21 }
   0xf   : > { %v174_v2 = vld [vmem:[%s163_s16] sm:$0xf] }
  0x10   : > { %300 = vmatpush.msk.msra.mxu0 %vm182_vm0, %v174_v2  ;;  %306 = vmatpush.msk.msra.mxu1 %vm182_vm0, %v174_v2 }
  0x11   : > { %301 = vmatmul.msk.f32.vlgmr.msra.gmra.mxu0 %vm175_vm1, %v172_v0  ;;  %302 = vmatmul.msk.f32.vlgmr.msra.gmra.mxu1 %vm175_vm1, %v173_v1 }
  0x8e   : > { %v203_v3 = vpop.f32.mrf.mxu0  ;;  %v206_v4 = vpop.f32.mrf.mxu1 }
  0x8f   : > { %210 = vst.msk [vmem:[%s171_s24] sm:$0xff] %vm209_vm2, %v203_v3 }
  0x90   : > { %211 = vst.msk [vmem:[%s171_s24 + $0x8] sm:$0xff] %vm209_vm2, %v206_v4 }
  0x91 PF: > { %s12_s11 = sadd.s32 1, %s353_s11   ;;  %s409_s9 = smov %s349_s10 }
  0x92   : > { %p9_p5 = scmp.ge.s32.totalorder %s12_s11, 4   ;;  %s410_s10 = smov %s412_s12 }
  0x94   :  { %11 = sbr.rel (!%p9_p5) target bundleno = 2 (0x2), region = 58 }

// kernel: resnet_base_oc_forward.39
= control target key start
LH: loop header
LB: loop body
LE: loop exit
PB: predicated region body
PF: predicated region fallthrough
CT: control target
= control target key end

     0   :  { %s282_s9 = smov 0   ;;  %s305_s0 = inlined_call_operand.vmem [shape: f32[16,4], index: 0, kind: input, shape index: {}]   ;;  %s306_s1 = inlined_call_operand.vmem [shape: f32[32,4,5], index: 1, kind: input, shape index: {}]   ;;  %s307_s2 = inlined_call_operand.vmem [shape: f32[32,16,5], index: 2, kind: output, shape index: {}]  }
   0x1 LB: > { %s236_s10 = sadd.s32 4294967295, %s265_s9   ;;  %p240_p0 = scmp.ge.s32.totalorder %s265_s9, 1  ;;  %s265_s9 = sphi %s282_s9, %s12_s9  }
   0x2   : > { %p111_p1 = scmp.lt.s32.totalorder %s265_s9, 33 }
   0x4   : > { %p112_p2 = pnand %p240_p0, %p111_p1 }
   0x5   : > { %p132_p3 = scmp.lt.s32.totalorder (!%p112_p2), %s236_s10, 31 }
   0x6   : > { %115 = sbr.rel (%p112_p2) target bundleno = 144 (0x90), region = 28 }
   0xb   : > { %s309_s10 = smov (!%p132_p3, %s236_s10), 31  ;;  %vm151_vm0 = vcmask 1043456   ;;  %v141_v0 = vld [vmem:[%s305_s0] sm:$0xff]  ;;  %vm144_vm1 = vcmask 31744   ;;  %v142_v1 = vld [vmem:[%s305_s0 + $0x8] sm:$0xff]  ;;  %vm178_vm2 = vcmask 39936  }
   0xc   : > { %s241_s11 = sshll.u32 %s309_s10, 2  ;;  %s249_s19 = sshll.u32 %s309_s10, 4 }
   0xd   : > { %s135_s14 = scalar_lea.vmem %s306_s1, %s241_s11  ;;  %s140_s22 = scalar_lea.vmem %s307_s2, %s249_s19 }
   0xe   : > { %v143_v2 = vld [vmem:[%s135_s14] sm:$0xf] }
   0xf   : > { %244 = vmatpush.msk.msra.mxu0 %vm151_vm0, %v143_v2  ;;  %250 = vmatpush.msk.msra.mxu1 %vm151_vm0, %v143_v2 }
  0x10   : > { %245 = vmatmul.msk.f32.vlgmr.msra.gmra.mxu0 %vm144_vm1, %v141_v0  ;;  %246 = vmatmul.msk.f32.vlgmr.msra.gmra.mxu1 %vm144_vm1, %v142_v1 }
  0x8d   : > { %v172_v3 = vpop.f32.mrf.mxu0  ;;  %v175_v4 = vpop.f32.mrf.mxu1 }
  0x8e   : > { %179 = vst.msk [vmem:[%s140_s22] sm:$0xff] %vm178_vm2, %v172_v3 }
  0x8f   : > { %180 = vst.msk [vmem:[%s140_s22 + $0x8] sm:$0xff] %vm178_vm2, %v175_v4 }
  0x90 PF: > { %s12_s9 = sadd.s32 1, %s265_s9  }
  0x91   : > { %p9_p4 = scmp.ge.s32.totalorder %s12_s9, 34  }
  0x93   :  { %11 = sbr.rel (!%p9_p4) target bundleno = 1 (0x1), region = 58 }

</bundles_post_ra>
